<compile_context>
chip_gen: v7x
topology: tpu7x:2x2x1
jax: 0.10.0
libtpu: 0.0.40
codegen_flags: <defaults>
</compile_context>

<pallas_src>
import functools

import jax
import jax.numpy as jnp
from jax.experimental import pallas as pl
from jax.experimental.pallas import tpu as pltpu

MAX_ITER = 15
LANE_CAP = 512            # max folded lane width (TB*M) per block
FALLBACK_ELEMS = 1 << 20  # max TB*N*M elements per block on the fallback path


def _sinkhorn_folded_kernel(inv_temp_ref, s_ref, o_ref, *, group, max_iter, is_norm):
    """Block (1, N, L): lane j holds matrix j // group, column j % group."""
    _, _, lanes = s_ref.shape
    inv_temp = inv_temp_ref[0]
    x = s_ref[0].astype(jnp.float32) * inv_temp            # (N, L)

    # Initial logsumexp over rows (PyTorch dim=1): max-stabilized sublane reduce.
    m = jnp.max(x, axis=0, keepdims=True)                  # (1, L)
    s = x - m
    s = s - jnp.log(jnp.sum(jnp.exp(s), axis=0, keepdims=True))
    # Invariant: s <= 0 from here on -> exp(s) <= 1; no further max shift needed.

    # Loop-invariant lane masks for the in-group butterfly (group is a power of 2).
    steps = []
    if group < lanes:
        off = jax.lax.broadcasted_iota(jnp.int32, (1, lanes), 1) % group
        k = 1
        while k < group:
            steps.append((k, (off & k) != 0))
            k *= 2

    def col_sum(p):
        # Sum within each aligned group of `group` lanes, broadcast back.
        if group == lanes:
            return jnp.sum(p, axis=1, keepdims=True)
        acc = p
        for k, hi_bit in steps:
            fwd = pltpu.roll(acc, lanes - k, axis=1)        # acc[:, j + k]
            bwd = pltpu.roll(acc, k, axis=1)                # acc[:, j - k]
            acc = acc + jnp.where(hi_bit, bwd, fwd)
        return acc

    def row_sum(p):
        return jnp.sum(p, axis=0, keepdims=True)

    if is_norm and max_iter > 0:
        for i in range(max_iter - 1):
            p = jnp.exp(s)
            s = s - jnp.log(col_sum(p) if i % 2 == 0 else row_sum(p))
        p = jnp.exp(s)                                      # fused final iteration
        den = col_sum(p) if (max_iter - 1) % 2 == 0 else row_sum(p)
        out = p / den
    else:
        out = jnp.exp(s)
    o_ref[0] = out.astype(o_ref.dtype)


def _sinkhorn_batch_kernel(inv_temp_ref, s_ref, o_ref, *, max_iter, is_norm):
    """Block (TB, N, M): TB independent matrices, normalized over axes 1 / 2."""
    inv_temp = inv_temp_ref[0]
    x = s_ref[...].astype(jnp.float32) * inv_temp
    m = jnp.max(x, axis=1, keepdims=True)
    s = x - m
    s = s - jnp.log(jnp.sum(jnp.exp(s), axis=1, keepdims=True))
    if is_norm and max_iter > 0:
        for i in range(max_iter - 1):
            axis = 2 if i % 2 == 0 else 1
            s = s - jnp.log(jnp.sum(jnp.exp(s), axis=axis, keepdims=True))
        axis = 2 if (max_iter - 1) % 2 == 0 else 1
        p = jnp.exp(s)                                      # fused final iteration
        out = p / jnp.sum(p, axis=axis, keepdims=True)
    else:
        out = jnp.exp(s)
    o_ref[...] = out.astype(o_ref.dtype)


def _compiler_params():
    return pltpu.CompilerParams(
        dimension_semantics=("parallel",),        # batch axis -> v7x 2-TC split
        vmem_limit_bytes=48 * 1024 * 1024,        # raise scoped VMEM, < v7x 64 MiB
    )


def _pad_batch(x, b_pad):
    b = x.shape[0]
    if b_pad == b:
        return x
    pad = jnp.zeros((b_pad - b,) + x.shape[1:], dtype=x.dtype)
    return jnp.concatenate([x, pad], axis=0)


def sinkhorn(s, temp, *, max_iter=MAX_ITER, is_norm=True):
    """Pallas implementation of Sinkhorn.forward (log path, the module default)."""
    assert s.ndim == 3, "expected (B, N, M)"
    B, N, M = s.shape
    # Scalar 1/temp computed once on the wrapper side, prefetched into SMEM.
    inv_temp = jnp.reshape(1.0 / jnp.asarray(temp, dtype=jnp.float32), (1,))

    if M < 128 and 128 % M == 0:
        # ---- lane-folded path: TB matrices per block, lane width TB*M >= 128 ----
        tb = 128 // M
        while tb * 2 * M <= LANE_CAP and tb * 2 <= B:
            tb *= 2
        G = pl.cdiv(B, tb)
        L = tb * M
        x = _pad_batch(s, G * tb)
        # (G*tb, N, M) -> (G, N, tb*M): lane t*M + m of block g = s[g*tb+t, n, m]
        x = x.reshape(G, tb, N, M).transpose(0, 2, 1, 3).reshape(G, N, L)
        kernel = functools.partial(
            _sinkhorn_folded_kernel, group=M, max_iter=max_iter, is_norm=is_norm)
        out = pl.pallas_call(
            kernel,
            out_shape=jax.ShapeDtypeStruct((G, N, L), s.dtype),
            grid_spec=pltpu.PrefetchScalarGridSpec(
                num_scalar_prefetch=1,
                grid=(G,),
                in_specs=[pl.BlockSpec((1, N, L), lambda g, t: (g, 0, 0))],
                out_specs=pl.BlockSpec((1, N, L), lambda g, t: (g, 0, 0)),
            ),
            compiler_params=_compiler_params(),
        )(inv_temp, x)
        out = out.reshape(G, N, tb, M).transpose(0, 2, 1, 3).reshape(G * tb, N, M)
        return out[:B]

    # ---- fallback path: TB matrices per block along the leading dim ----
    tb = max(1, min(B, FALLBACK_ELEMS // max(1, N * M)))
    G = pl.cdiv(B, tb)
    x = _pad_batch(s, G * tb)
    kernel = functools.partial(
        _sinkhorn_batch_kernel, max_iter=max_iter, is_norm=is_norm)
    out = pl.pallas_call(
        kernel,
        out_shape=jax.ShapeDtypeStruct((G * tb, N, M), s.dtype),
        grid_spec=pltpu.PrefetchScalarGridSpec(
            num_scalar_prefetch=1,
            grid=(G,),
            in_specs=[pl.BlockSpec((tb, N, M), lambda g, t: (g, 0, 0))],
            out_specs=pl.BlockSpec((tb, N, M), lambda g, t: (g, 0, 0)),
        ),
        compiler_params=_compiler_params(),
    )(inv_temp, x)
    return out[:B]


def _sinkhorn_ref(s, temp, *, max_iter=MAX_ITER, is_norm=True):
    """Pure-JAX reference mirroring the PyTorch forward_log."""
    s = s / temp
    s = s - jax.scipy.special.logsumexp(s, axis=1, keepdims=True)
    if is_norm:
        for i in range(max_iter):
            axis = 2 if i % 2 == 0 else 1
            s = s - jax.scipy.special.logsumexp(s, axis=axis, keepdims=True)
    return jnp.exp(s)


def _check(key, shape, temp):
    s = jax.random.normal(key, shape, dtype=jnp.float32)
    out = jax.block_until_ready(sinkhorn(s, temp))
    ref = _sinkhorn_ref(s, temp)
    assert out.shape == shape
    assert jnp.allclose(out, ref, atol=1e-5, rtol=1e-5), (
        f"mismatch vs reference for shape {shape}: "
        f"max abs err {jnp.max(jnp.abs(out - ref))}")
    return out


if __name__ == "__main__":
    key = jax.random.PRNGKey(0)
    k0, k1, k2 = jax.random.split(key, 3)
    # lane-folded path: 6 (padded to 8) 16x16 matrices folded into 128 lanes
    _check(k0, (6, 16, 16), 0.5)
    # lane-folded path with non-(8,128)-aligned rows and a padded batch
    _check(k1, (5, 12, 16), 0.7)
    # fallback (batch-blocked) path with non-aligned N and M
    _check(k2, (3, 20, 40), 0.5)
    print("KERNEL_OK")
</pallas_src>

<mosaic_0001>
module attributes {stable_mosaic.version = 11 : i64} {
  func.func @_sinkhorn_folded_kernel(%arg0: i32, %arg1: memref<1xf32, #tpu.memory_space<smem>>, %arg2: memref<1x16x128xf32, #tpu.memory_space<vmem>>, %arg3: memref<1x16x128xf32, #tpu.memory_space<vmem>>) attributes {dimension_semantics = [#tpu.dimension_semantics<parallel>], iteration_bounds = array<i64: 1>, scalar_prefetch = 1 : i64, scratch_operands = 0 : i64, tpu.core_type = #tpu.core_type<tc>, window_params = [{transform_indices = @transform_0, window_bounds = array<i64: 1, 16, 128>}, {transform_indices = @transform_1, window_bounds = array<i64: 1, 16, 128>}]} {
    %c0 = arith.constant 0 : index
    %0 = memref.load %arg1[%c0] : memref<1xf32, #tpu.memory_space<smem>>
    %c0_0 = arith.constant 0 : index
    %c0_1 = arith.constant 0 : index
    %c0_2 = arith.constant 0 : index
    %1 = vector.load %arg2[%c0_0, %c0_1, %c0_2] : memref<1x16x128xf32, #tpu.memory_space<vmem>>, vector<1x16x128xf32>
    %2 = vector.shape_cast %1 : vector<1x16x128xf32> to vector<16x128xf32>
    %3 = vector.broadcast %0 : f32 to vector<16x128xf32>
    %4 = arith.mulf %2, %3 : vector<16x128xf32>
    %cst = arith.constant dense<0xFF800000> : vector<128xf32>
    %5 = vector.multi_reduction <maximumf>, %4, %cst [0] : vector<16x128xf32> to vector<128xf32>
    %6 = vector.shape_cast %5 : vector<128xf32> to vector<1x128xf32>
    %7 = vector.broadcast %6 : vector<1x128xf32> to vector<16x128xf32>
    %8 = arith.subf %4, %7 : vector<16x128xf32>
    %9 = math.exp %8 : vector<16x128xf32>
    %cst_3 = arith.constant dense<0.000000e+00> : vector<128xf32>
    %10 = vector.multi_reduction <add>, %9, %cst_3 [0] : vector<16x128xf32> to vector<128xf32>
    %11 = vector.shape_cast %10 : vector<128xf32> to vector<1x128xf32>
    %12 = math.log %11 : vector<1x128xf32>
    %13 = vector.broadcast %12 : vector<1x128xf32> to vector<16x128xf32>
    %14 = arith.subf %8, %13 : vector<16x128xf32>
    %15 = tpu.iota {dimensions = array<i32: 1>} : vector<1x128xi32>
    %c16_i32 = arith.constant 16 : i32
    %c0_i32 = arith.constant 0 : i32
    %16 = arith.cmpi eq, %c16_i32, %c0_i32 : i32
    %c1_i32 = arith.constant 1 : i32
    %17 = arith.select %16, %c1_i32, %c16_i32 : i32
    %18 = vector.broadcast %17 : i32 to vector<1x128xi32>
    %19 = arith.remsi %15, %18 : vector<1x128xi32>
    %c0_i32_4 = arith.constant 0 : i32
    %20 = vector.broadcast %c0_i32_4 : i32 to vector<1x128xi32>
    %21 = arith.cmpi ne, %19, %20 : vector<1x128xi32>
    %c0_i32_5 = arith.constant 0 : i32
    %22 = vector.broadcast %c0_i32_5 : i32 to vector<1x128xi32>
    %23 = arith.cmpi slt, %19, %22 : vector<1x128xi32>
    %c0_i32_6 = arith.constant 0 : i32
    %24 = arith.cmpi slt, %17, %c0_i32_6 : i32
    %25 = vector.broadcast %24 : i1 to vector<1x128xi1>
    %26 = vector.broadcast %25 : vector<1x128xi1> to vector<1x128xi1>
    %27 = arith.xori %23, %26 : vector<1x128xi1>
    %28 = arith.andi %27, %21 : vector<1x128xi1>
    %29 = vector.broadcast %17 : i32 to vector<1x128xi32>
    %30 = arith.addi %19, %29 : vector<1x128xi32>
    %31 = arith.select %28, %30, %19 : vector<1x128xi1>, vector<1x128xi32>
    %c1_i32_7 = arith.constant 1 : i32
    %32 = vector.broadcast %c1_i32_7 : i32 to vector<1x128xi32>
    %33 = arith.andi %31, %32 : vector<1x128xi32>
    %c0_i32_8 = arith.constant 0 : i32
    %34 = vector.broadcast %c0_i32_8 : i32 to vector<1x128xi32>
    %35 = arith.cmpi ne, %33, %34 : vector<1x128xi32>
    %c2_i32 = arith.constant 2 : i32
    %36 = vector.broadcast %c2_i32 : i32 to vector<1x128xi32>
    %37 = arith.andi %31, %36 : vector<1x128xi32>
    %c0_i32_9 = arith.constant 0 : i32
    %38 = vector.broadcast %c0_i32_9 : i32 to vector<1x128xi32>
    %39 = arith.cmpi ne, %37, %38 : vector<1x128xi32>
    %c4_i32 = arith.constant 4 : i32
    %40 = vector.broadcast %c4_i32 : i32 to vector<1x128xi32>
    %41 = arith.andi %31, %40 : vector<1x128xi32>
    %c0_i32_10 = arith.constant 0 : i32
    %42 = vector.broadcast %c0_i32_10 : i32 to vector<1x128xi32>
    %43 = arith.cmpi ne, %41, %42 : vector<1x128xi32>
    %c8_i32 = arith.constant 8 : i32
    %44 = vector.broadcast %c8_i32 : i32 to vector<1x128xi32>
    %45 = arith.andi %31, %44 : vector<1x128xi32>
    %c0_i32_11 = arith.constant 0 : i32
    %46 = vector.broadcast %c0_i32_11 : i32 to vector<1x128xi32>
    %47 = arith.cmpi ne, %45, %46 : vector<1x128xi32>
    %48 = math.exp %14 : vector<16x128xf32>
    %c127_i32 = arith.constant 127 : i32
    %49 = tpu.dynamic_rotate %48 by %c127_i32 dim 1 : vector<16x128xf32>, i32 -> vector<16x128xf32>
    %c1_i32_12 = arith.constant 1 : i32
    %50 = tpu.dynamic_rotate %48 by %c1_i32_12 dim 1 : vector<16x128xf32>, i32 -> vector<16x128xf32>
    %51 = vector.shape_cast %35 : vector<1x128xi1> to vector<1x128xi1>
    %52 = vector.broadcast %51 : vector<1x128xi1> to vector<16x128xi1>
    %53 = arith.select %52, %50, %49 : vector<16x128xi1>, vector<16x128xf32>
    %54 = arith.addf %48, %53 : vector<16x128xf32>
    %c126_i32 = arith.constant 126 : i32
    %55 = tpu.dynamic_rotate %54 by %c126_i32 dim 1 : vector<16x128xf32>, i32 -> vector<16x128xf32>
    %c2_i32_13 = arith.constant 2 : i32
    %56 = tpu.dynamic_rotate %54 by %c2_i32_13 dim 1 : vector<16x128xf32>, i32 -> vector<16x128xf32>
    %57 = vector.shape_cast %39 : vector<1x128xi1> to vector<1x128xi1>
    %58 = vector.broadcast %57 : vector<1x128xi1> to vector<16x128xi1>
    %59 = arith.select %58, %56, %55 : vector<16x128xi1>, vector<16x128xf32>
    %60 = arith.addf %54, %59 : vector<16x128xf32>
    %c124_i32 = arith.constant 124 : i32
    %61 = tpu.dynamic_rotate %60 by %c124_i32 dim 1 : vector<16x128xf32>, i32 -> vector<16x128xf32>
    %c4_i32_14 = arith.constant 4 : i32
    %62 = tpu.dynamic_rotate %60 by %c4_i32_14 dim 1 : vector<16x128xf32>, i32 -> vector<16x128xf32>
    %63 = vector.shape_cast %43 : vector<1x128xi1> to vector<1x128xi1>
    %64 = vector.broadcast %63 : vector<1x128xi1> to vector<16x128xi1>
    %65 = arith.select %64, %62, %61 : vector<16x128xi1>, vector<16x128xf32>
    %66 = arith.addf %60, %65 : vector<16x128xf32>
    %c120_i32 = arith.constant 120 : i32
    %67 = tpu.dynamic_rotate %66 by %c120_i32 dim 1 : vector<16x128xf32>, i32 -> vector<16x128xf32>
    %c8_i32_15 = arith.constant 8 : i32
    %68 = tpu.dynamic_rotate %66 by %c8_i32_15 dim 1 : vector<16x128xf32>, i32 -> vector<16x128xf32>
    %69 = vector.shape_cast %47 : vector<1x128xi1> to vector<1x128xi1>
    %70 = vector.broadcast %69 : vector<1x128xi1> to vector<16x128xi1>
    %71 = arith.select %70, %68, %67 : vector<16x128xi1>, vector<16x128xf32>
    %72 = arith.addf %66, %71 : vector<16x128xf32>
    %73 = math.log %72 : vector<16x128xf32>
    %74 = arith.subf %14, %73 : vector<16x128xf32>
    %75 = math.exp %74 : vector<16x128xf32>
    %cst_16 = arith.constant dense<0.000000e+00> : vector<128xf32>
    %76 = vector.multi_reduction <add>, %75, %cst_16 [0] : vector<16x128xf32> to vector<128xf32>
    %77 = vector.shape_cast %76 : vector<128xf32> to vector<1x128xf32>
    %78 = math.log %77 : vector<1x128xf32>
    %79 = vector.broadcast %78 : vector<1x128xf32> to vector<16x128xf32>
    %80 = arith.subf %74, %79 : vector<16x128xf32>
    %81 = math.exp %80 : vector<16x128xf32>
    %c127_i32_17 = arith.constant 127 : i32
    %82 = tpu.dynamic_rotate %81 by %c127_i32_17 dim 1 : vector<16x128xf32>, i32 -> vector<16x128xf32>
    %c1_i32_18 = arith.constant 1 : i32
    %83 = tpu.dynamic_rotate %81 by %c1_i32_18 dim 1 : vector<16x128xf32>, i32 -> vector<16x128xf32>
    %84 = vector.shape_cast %35 : vector<1x128xi1> to vector<1x128xi1>
    %85 = vector.broadcast %84 : vector<1x128xi1> to vector<16x128xi1>
    %86 = arith.select %85, %83, %82 : vector<16x128xi1>, vector<16x128xf32>
    %87 = arith.addf %81, %86 : vector<16x128xf32>
    %c126_i32_19 = arith.constant 126 : i32
    %88 = tpu.dynamic_rotate %87 by %c126_i32_19 dim 1 : vector<16x128xf32>, i32 -> vector<16x128xf32>
    %c2_i32_20 = arith.constant 2 : i32
    %89 = tpu.dynamic_rotate %87 by %c2_i32_20 dim 1 : vector<16x128xf32>, i32 -> vector<16x128xf32>
    %90 = vector.shape_cast %39 : vector<1x128xi1> to vector<1x128xi1>
    %91 = vector.broadcast %90 : vector<1x128xi1> to vector<16x128xi1>
    %92 = arith.select %91, %89, %88 : vector<16x128xi1>, vector<16x128xf32>
    %93 = arith.addf %87, %92 : vector<16x128xf32>
    %c124_i32_21 = arith.constant 124 : i32
    %94 = tpu.dynamic_rotate %93 by %c124_i32_21 dim 1 : vector<16x128xf32>, i32 -> vector<16x128xf32>
    %c4_i32_22 = arith.constant 4 : i32
    %95 = tpu.dynamic_rotate %93 by %c4_i32_22 dim 1 : vector<16x128xf32>, i32 -> vector<16x128xf32>
    %96 = vector.shape_cast %43 : vector<1x128xi1> to vector<1x128xi1>
    %97 = vector.broadcast %96 : vector<1x128xi1> to vector<16x128xi1>
    %98 = arith.select %97, %95, %94 : vector<16x128xi1>, vector<16x128xf32>
    %99 = arith.addf %93, %98 : vector<16x128xf32>
    %c120_i32_23 = arith.constant 120 : i32
    %100 = tpu.dynamic_rotate %99 by %c120_i32_23 dim 1 : vector<16x128xf32>, i32 -> vector<16x128xf32>
    %c8_i32_24 = arith.constant 8 : i32
    %101 = tpu.dynamic_rotate %99 by %c8_i32_24 dim 1 : vector<16x128xf32>, i32 -> vector<16x128xf32>
    %102 = vector.shape_cast %47 : vector<1x128xi1> to vector<1x128xi1>
    %103 = vector.broadcast %102 : vector<1x128xi1> to vector<16x128xi1>
    %104 = arith.select %103, %101, %100 : vector<16x128xi1>, vector<16x128xf32>
    %105 = arith.addf %99, %104 : vector<16x128xf32>
    %106 = math.log %105 : vector<16x128xf32>
    %107 = arith.subf %80, %106 : vector<16x128xf32>
    %108 = math.exp %107 : vector<16x128xf32>
    %cst_25 = arith.constant dense<0.000000e+00> : vector<128xf32>
    %109 = vector.multi_reduction <add>, %108, %cst_25 [0] : vector<16x128xf32> to vector<128xf32>
    %110 = vector.shape_cast %109 : vector<128xf32> to vector<1x128xf32>
    %111 = math.log %110 : vector<1x128xf32>
    %112 = vector.broadcast %111 : vector<1x128xf32> to vector<16x128xf32>
    %113 = arith.subf %107, %112 : vector<16x128xf32>
    %114 = math.exp %113 : vector<16x128xf32>
    %c127_i32_26 = arith.constant 127 : i32
    %115 = tpu.dynamic_rotate %114 by %c127_i32_26 dim 1 : vector<16x128xf32>, i32 -> vector<16x128xf32>
    %c1_i32_27 = arith.constant 1 : i32
    %116 = tpu.dynamic_rotate %114 by %c1_i32_27 dim 1 : vector<16x128xf32>, i32 -> vector<16x128xf32>
    %117 = vector.shape_cast %35 : vector<1x128xi1> to vector<1x128xi1>
    %118 = vector.broadcast %117 : vector<1x128xi1> to vector<16x128xi1>
    %119 = arith.select %118, %116, %115 : vector<16x128xi1>, vector<16x128xf32>
    %120 = arith.addf %114, %119 : vector<16x128xf32>
    %c126_i32_28 = arith.constant 126 : i32
    %121 = tpu.dynamic_rotate %120 by %c126_i32_28 dim 1 : vector<16x128xf32>, i32 -> vector<16x128xf32>
    %c2_i32_29 = arith.constant 2 : i32
    %122 = tpu.dynamic_rotate %120 by %c2_i32_29 dim 1 : vector<16x128xf32>, i32 -> vector<16x128xf32>
    %123 = vector.shape_cast %39 : vector<1x128xi1> to vector<1x128xi1>
    %124 = vector.broadcast %123 : vector<1x128xi1> to vector<16x128xi1>
    %125 = arith.select %124, %122, %121 : vector<16x128xi1>, vector<16x128xf32>
    %126 = arith.addf %120, %125 : vector<16x128xf32>
    %c124_i32_30 = arith.constant 124 : i32
    %127 = tpu.dynamic_rotate %126 by %c124_i32_30 dim 1 : vector<16x128xf32>, i32 -> vector<16x128xf32>
    %c4_i32_31 = arith.constant 4 : i32
    %128 = tpu.dynamic_rotate %126 by %c4_i32_31 dim 1 : vector<16x128xf32>, i32 -> vector<16x128xf32>
    %129 = vector.shape_cast %43 : vector<1x128xi1> to vector<1x128xi1>
    %130 = vector.broadcast %129 : vector<1x128xi1> to vector<16x128xi1>
    %131 = arith.select %130, %128, %127 : vector<16x128xi1>, vector<16x128xf32>
    %132 = arith.addf %126, %131 : vector<16x128xf32>
    %c120_i32_32 = arith.constant 120 : i32
    %133 = tpu.dynamic_rotate %132 by %c120_i32_32 dim 1 : vector<16x128xf32>, i32 -> vector<16x128xf32>
    %c8_i32_33 = arith.constant 8 : i32
    %134 = tpu.dynamic_rotate %132 by %c8_i32_33 dim 1 : vector<16x128xf32>, i32 -> vector<16x128xf32>
    %135 = vector.shape_cast %47 : vector<1x128xi1> to vector<1x128xi1>
    %136 = vector.broadcast %135 : vector<1x128xi1> to vector<16x128xi1>
    %137 = arith.select %136, %134, %133 : vector<16x128xi1>, vector<16x128xf32>
    %138 = arith.addf %132, %137 : vector<16x128xf32>
    %139 = math.log %138 : vector<16x128xf32>
    %140 = arith.subf %113, %139 : vector<16x128xf32>
    %141 = math.exp %140 : vector<16x128xf32>
    %cst_34 = arith.constant dense<0.000000e+00> : vector<128xf32>
    %142 = vector.multi_reduction <add>, %141, %cst_34 [0] : vector<16x128xf32> to vector<128xf32>
    %143 = vector.shape_cast %142 : vector<128xf32> to vector<1x128xf32>
    %144 = math.log %143 : vector<1x128xf32>
    %145 = vector.broadcast %144 : vector<1x128xf32> to vector<16x128xf32>
    %146 = arith.subf %140, %145 : vector<16x128xf32>
    %147 = math.exp %146 : vector<16x128xf32>
    %c127_i32_35 = arith.constant 127 : i32
    %148 = tpu.dynamic_rotate %147 by %c127_i32_35 dim 1 : vector<16x128xf32>, i32 -> vector<16x128xf32>
    %c1_i32_36 = arith.constant 1 : i32
    %149 = tpu.dynamic_rotate %147 by %c1_i32_36 dim 1 : vector<16x128xf32>, i32 -> vector<16x128xf32>
    %150 = vector.shape_cast %35 : vector<1x128xi1> to vector<1x128xi1>
    %151 = vector.broadcast %150 : vector<1x128xi1> to vector<16x128xi1>
    %152 = arith.select %151, %149, %148 : vector<16x128xi1>, vector<16x128xf32>
    %153 = arith.addf %147, %152 : vector<16x128xf32>
    %c126_i32_37 = arith.constant 126 : i32
    %154 = tpu.dynamic_rotate %153 by %c126_i32_37 dim 1 : vector<16x128xf32>, i32 -> vector<16x128xf32>
    %c2_i32_38 = arith.constant 2 : i32
    %155 = tpu.dynamic_rotate %153 by %c2_i32_38 dim 1 : vector<16x128xf32>, i32 -> vector<16x128xf32>
    %156 = vector.shape_cast %39 : vector<1x128xi1> to vector<1x128xi1>
    %157 = vector.broadcast %156 : vector<1x128xi1> to vector<16x128xi1>
    %158 = arith.select %157, %155, %154 : vector<16x128xi1>, vector<16x128xf32>
    %159 = arith.addf %153, %158 : vector<16x128xf32>
    %c124_i32_39 = arith.constant 124 : i32
    %160 = tpu.dynamic_rotate %159 by %c124_i32_39 dim 1 : vector<16x128xf32>, i32 -> vector<16x128xf32>
    %c4_i32_40 = arith.constant 4 : i32
    %161 = tpu.dynamic_rotate %159 by %c4_i32_40 dim 1 : vector<16x128xf32>, i32 -> vector<16x128xf32>
    %162 = vector.shape_cast %43 : vector<1x128xi1> to vector<1x128xi1>
    %163 = vector.broadcast %162 : vector<1x128xi1> to vector<16x128xi1>
    %164 = arith.select %163, %161, %160 : vector<16x128xi1>, vector<16x128xf32>
    %165 = arith.addf %159, %164 : vector<16x128xf32>
    %c120_i32_41 = arith.constant 120 : i32
    %166 = tpu.dynamic_rotate %165 by %c120_i32_41 dim 1 : vector<16x128xf32>, i32 -> vector<16x128xf32>
    %c8_i32_42 = arith.constant 8 : i32
    %167 = tpu.dynamic_rotate %165 by %c8_i32_42 dim 1 : vector<16x128xf32>, i32 -> vector<16x128xf32>
    %168 = vector.shape_cast %47 : vector<1x128xi1> to vector<1x128xi1>
    %169 = vector.broadcast %168 : vector<1x128xi1> to vector<16x128xi1>
    %170 = arith.select %169, %167, %166 : vector<16x128xi1>, vector<16x128xf32>
    %171 = arith.addf %165, %170 : vector<16x128xf32>
    %172 = math.log %171 : vector<16x128xf32>
    %173 = arith.subf %146, %172 : vector<16x128xf32>
    %174 = math.exp %173 : vector<16x128xf32>
    %cst_43 = arith.constant dense<0.000000e+00> : vector<128xf32>
    %175 = vector.multi_reduction <add>, %174, %cst_43 [0] : vector<16x128xf32> to vector<128xf32>
    %176 = vector.shape_cast %175 : vector<128xf32> to vector<1x128xf32>
    %177 = math.log %176 : vector<1x128xf32>
    %178 = vector.broadcast %177 : vector<1x128xf32> to vector<16x128xf32>
    %179 = arith.subf %173, %178 : vector<16x128xf32>
    %180 = math.exp %179 : vector<16x128xf32>
    %c127_i32_44 = arith.constant 127 : i32
    %181 = tpu.dynamic_rotate %180 by %c127_i32_44 dim 1 : vector<16x128xf32>, i32 -> vector<16x128xf32>
    %c1_i32_45 = arith.constant 1 : i32
    %182 = tpu.dynamic_rotate %180 by %c1_i32_45 dim 1 : vector<16x128xf32>, i32 -> vector<16x128xf32>
    %183 = vector.shape_cast %35 : vector<1x128xi1> to vector<1x128xi1>
    %184 = vector.broadcast %183 : vector<1x128xi1> to vector<16x128xi1>
    %185 = arith.select %184, %182, %181 : vector<16x128xi1>, vector<16x128xf32>
    %186 = arith.addf %180, %185 : vector<16x128xf32>
    %c126_i32_46 = arith.constant 126 : i32
    %187 = tpu.dynamic_rotate %186 by %c126_i32_46 dim 1 : vector<16x128xf32>, i32 -> vector<16x128xf32>
    %c2_i32_47 = arith.constant 2 : i32
    %188 = tpu.dynamic_rotate %186 by %c2_i32_47 dim 1 : vector<16x128xf32>, i32 -> vector<16x128xf32>
    %189 = vector.shape_cast %39 : vector<1x128xi1> to vector<1x128xi1>
    %190 = vector.broadcast %189 : vector<1x128xi1> to vector<16x128xi1>
    %191 = arith.select %190, %188, %187 : vector<16x128xi1>, vector<16x128xf32>
    %192 = arith.addf %186, %191 : vector<16x128xf32>
    %c124_i32_48 = arith.constant 124 : i32
    %193 = tpu.dynamic_rotate %192 by %c124_i32_48 dim 1 : vector<16x128xf32>, i32 -> vector<16x128xf32>
    %c4_i32_49 = arith.constant 4 : i32
    %194 = tpu.dynamic_rotate %192 by %c4_i32_49 dim 1 : vector<16x128xf32>, i32 -> vector<16x128xf32>
    %195 = vector.shape_cast %43 : vector<1x128xi1> to vector<1x128xi1>
    %196 = vector.broadcast %195 : vector<1x128xi1> to vector<16x128xi1>
    %197 = arith.select %196, %194, %193 : vector<16x128xi1>, vector<16x128xf32>
    %198 = arith.addf %192, %197 : vector<16x128xf32>
    %c120_i32_50 = arith.constant 120 : i32
    %199 = tpu.dynamic_rotate %198 by %c120_i32_50 dim 1 : vector<16x128xf32>, i32 -> vector<16x128xf32>
    %c8_i32_51 = arith.constant 8 : i32
    %200 = tpu.dynamic_rotate %198 by %c8_i32_51 dim 1 : vector<16x128xf32>, i32 -> vector<16x128xf32>
    %201 = vector.shape_cast %47 : vector<1x128xi1> to vector<1x128xi1>
    %202 = vector.broadcast %201 : vector<1x128xi1> to vector<16x128xi1>
    %203 = arith.select %202, %200, %199 : vector<16x128xi1>, vector<16x128xf32>
    %204 = arith.addf %198, %203 : vector<16x128xf32>
    %205 = math.log %204 : vector<16x128xf32>
    %206 = arith.subf %179, %205 : vector<16x128xf32>
    %207 = math.exp %206 : vector<16x128xf32>
    %cst_52 = arith.constant dense<0.000000e+00> : vector<128xf32>
    %208 = vector.multi_reduction <add>, %207, %cst_52 [0] : vector<16x128xf32> to vector<128xf32>
    %209 = vector.shape_cast %208 : vector<128xf32> to vector<1x128xf32>
    %210 = math.log %209 : vector<1x128xf32>
    %211 = vector.broadcast %210 : vector<1x128xf32> to vector<16x128xf32>
    %212 = arith.subf %206, %211 : vector<16x128xf32>
    %213 = math.exp %212 : vector<16x128xf32>
    %c127_i32_53 = arith.constant 127 : i32
    %214 = tpu.dynamic_rotate %213 by %c127_i32_53 dim 1 : vector<16x128xf32>, i32 -> vector<16x128xf32>
    %c1_i32_54 = arith.constant 1 : i32
    %215 = tpu.dynamic_rotate %213 by %c1_i32_54 dim 1 : vector<16x128xf32>, i32 -> vector<16x128xf32>
    %216 = vector.shape_cast %35 : vector<1x128xi1> to vector<1x128xi1>
    %217 = vector.broadcast %216 : vector<1x128xi1> to vector<16x128xi1>
    %218 = arith.select %217, %215, %214 : vector<16x128xi1>, vector<16x128xf32>
    %219 = arith.addf %213, %218 : vector<16x128xf32>
    %c126_i32_55 = arith.constant 126 : i32
    %220 = tpu.dynamic_rotate %219 by %c126_i32_55 dim 1 : vector<16x128xf32>, i32 -> vector<16x128xf32>
    %c2_i32_56 = arith.constant 2 : i32
    %221 = tpu.dynamic_rotate %219 by %c2_i32_56 dim 1 : vector<16x128xf32>, i32 -> vector<16x128xf32>
    %222 = vector.shape_cast %39 : vector<1x128xi1> to vector<1x128xi1>
    %223 = vector.broadcast %222 : vector<1x128xi1> to vector<16x128xi1>
    %224 = arith.select %223, %221, %220 : vector<16x128xi1>, vector<16x128xf32>
    %225 = arith.addf %219, %224 : vector<16x128xf32>
    %c124_i32_57 = arith.constant 124 : i32
    %226 = tpu.dynamic_rotate %225 by %c124_i32_57 dim 1 : vector<16x128xf32>, i32 -> vector<16x128xf32>
    %c4_i32_58 = arith.constant 4 : i32
    %227 = tpu.dynamic_rotate %225 by %c4_i32_58 dim 1 : vector<16x128xf32>, i32 -> vector<16x128xf32>
    %228 = vector.shape_cast %43 : vector<1x128xi1> to vector<1x128xi1>
    %229 = vector.broadcast %228 : vector<1x128xi1> to vector<16x128xi1>
    %230 = arith.select %229, %227, %226 : vector<16x128xi1>, vector<16x128xf32>
    %231 = arith.addf %225, %230 : vector<16x128xf32>
    %c120_i32_59 = arith.constant 120 : i32
    %232 = tpu.dynamic_rotate %231 by %c120_i32_59 dim 1 : vector<16x128xf32>, i32 -> vector<16x128xf32>
    %c8_i32_60 = arith.constant 8 : i32
    %233 = tpu.dynamic_rotate %231 by %c8_i32_60 dim 1 : vector<16x128xf32>, i32 -> vector<16x128xf32>
    %234 = vector.shape_cast %47 : vector<1x128xi1> to vector<1x128xi1>
    %235 = vector.broadcast %234 : vector<1x128xi1> to vector<16x128xi1>
    %236 = arith.select %235, %233, %232 : vector<16x128xi1>, vector<16x128xf32>
    %237 = arith.addf %231, %236 : vector<16x128xf32>
    %238 = math.log %237 : vector<16x128xf32>
    %239 = arith.subf %212, %238 : vector<16x128xf32>
    %240 = math.exp %239 : vector<16x128xf32>
    %cst_61 = arith.constant dense<0.000000e+00> : vector<128xf32>
    %241 = vector.multi_reduction <add>, %240, %cst_61 [0] : vector<16x128xf32> to vector<128xf32>
    %242 = vector.shape_cast %241 : vector<128xf32> to vector<1x128xf32>
    %243 = math.log %242 : vector<1x128xf32>
    %244 = vector.broadcast %243 : vector<1x128xf32> to vector<16x128xf32>
    %245 = arith.subf %239, %244 : vector<16x128xf32>
    %246 = math.exp %245 : vector<16x128xf32>
    %c127_i32_62 = arith.constant 127 : i32
    %247 = tpu.dynamic_rotate %246 by %c127_i32_62 dim 1 : vector<16x128xf32>, i32 -> vector<16x128xf32>
    %c1_i32_63 = arith.constant 1 : i32
    %248 = tpu.dynamic_rotate %246 by %c1_i32_63 dim 1 : vector<16x128xf32>, i32 -> vector<16x128xf32>
    %249 = vector.shape_cast %35 : vector<1x128xi1> to vector<1x128xi1>
    %250 = vector.broadcast %249 : vector<1x128xi1> to vector<16x128xi1>
    %251 = arith.select %250, %248, %247 : vector<16x128xi1>, vector<16x128xf32>
    %252 = arith.addf %246, %251 : vector<16x128xf32>
    %c126_i32_64 = arith.constant 126 : i32
    %253 = tpu.dynamic_rotate %252 by %c126_i32_64 dim 1 : vector<16x128xf32>, i32 -> vector<16x128xf32>
    %c2_i32_65 = arith.constant 2 : i32
    %254 = tpu.dynamic_rotate %252 by %c2_i32_65 dim 1 : vector<16x128xf32>, i32 -> vector<16x128xf32>
    %255 = vector.shape_cast %39 : vector<1x128xi1> to vector<1x128xi1>
    %256 = vector.broadcast %255 : vector<1x128xi1> to vector<16x128xi1>
    %257 = arith.select %256, %254, %253 : vector<16x128xi1>, vector<16x128xf32>
    %258 = arith.addf %252, %257 : vector<16x128xf32>
    %c124_i32_66 = arith.constant 124 : i32
    %259 = tpu.dynamic_rotate %258 by %c124_i32_66 dim 1 : vector<16x128xf32>, i32 -> vector<16x128xf32>
    %c4_i32_67 = arith.constant 4 : i32
    %260 = tpu.dynamic_rotate %258 by %c4_i32_67 dim 1 : vector<16x128xf32>, i32 -> vector<16x128xf32>
    %261 = vector.shape_cast %43 : vector<1x128xi1> to vector<1x128xi1>
    %262 = vector.broadcast %261 : vector<1x128xi1> to vector<16x128xi1>
    %263 = arith.select %262, %260, %259 : vector<16x128xi1>, vector<16x128xf32>
    %264 = arith.addf %258, %263 : vector<16x128xf32>
    %c120_i32_68 = arith.constant 120 : i32
    %265 = tpu.dynamic_rotate %264 by %c120_i32_68 dim 1 : vector<16x128xf32>, i32 -> vector<16x128xf32>
    %c8_i32_69 = arith.constant 8 : i32
    %266 = tpu.dynamic_rotate %264 by %c8_i32_69 dim 1 : vector<16x128xf32>, i32 -> vector<16x128xf32>
    %267 = vector.shape_cast %47 : vector<1x128xi1> to vector<1x128xi1>
    %268 = vector.broadcast %267 : vector<1x128xi1> to vector<16x128xi1>
    %269 = arith.select %268, %266, %265 : vector<16x128xi1>, vector<16x128xf32>
    %270 = arith.addf %264, %269 : vector<16x128xf32>
    %271 = math.log %270 : vector<16x128xf32>
    %272 = arith.subf %245, %271 : vector<16x128xf32>
    %273 = math.exp %272 : vector<16x128xf32>
    %cst_70 = arith.constant dense<0.000000e+00> : vector<128xf32>
    %274 = vector.multi_reduction <add>, %273, %cst_70 [0] : vector<16x128xf32> to vector<128xf32>
    %275 = vector.shape_cast %274 : vector<128xf32> to vector<1x128xf32>
    %276 = math.log %275 : vector<1x128xf32>
    %277 = vector.broadcast %276 : vector<1x128xf32> to vector<16x128xf32>
    %278 = arith.subf %272, %277 : vector<16x128xf32>
    %279 = math.exp %278 : vector<16x128xf32>
    %c127_i32_71 = arith.constant 127 : i32
    %280 = tpu.dynamic_rotate %279 by %c127_i32_71 dim 1 : vector<16x128xf32>, i32 -> vector<16x128xf32>
    %c1_i32_72 = arith.constant 1 : i32
    %281 = tpu.dynamic_rotate %279 by %c1_i32_72 dim 1 : vector<16x128xf32>, i32 -> vector<16x128xf32>
    %282 = vector.shape_cast %35 : vector<1x128xi1> to vector<1x128xi1>
    %283 = vector.broadcast %282 : vector<1x128xi1> to vector<16x128xi1>
    %284 = arith.select %283, %281, %280 : vector<16x128xi1>, vector<16x128xf32>
    %285 = arith.addf %279, %284 : vector<16x128xf32>
    %c126_i32_73 = arith.constant 126 : i32
    %286 = tpu.dynamic_rotate %285 by %c126_i32_73 dim 1 : vector<16x128xf32>, i32 -> vector<16x128xf32>
    %c2_i32_74 = arith.constant 2 : i32
    %287 = tpu.dynamic_rotate %285 by %c2_i32_74 dim 1 : vector<16x128xf32>, i32 -> vector<16x128xf32>
    %288 = vector.shape_cast %39 : vector<1x128xi1> to vector<1x128xi1>
    %289 = vector.broadcast %288 : vector<1x128xi1> to vector<16x128xi1>
    %290 = arith.select %289, %287, %286 : vector<16x128xi1>, vector<16x128xf32>
    %291 = arith.addf %285, %290 : vector<16x128xf32>
    %c124_i32_75 = arith.constant 124 : i32
    %292 = tpu.dynamic_rotate %291 by %c124_i32_75 dim 1 : vector<16x128xf32>, i32 -> vector<16x128xf32>
    %c4_i32_76 = arith.constant 4 : i32
    %293 = tpu.dynamic_rotate %291 by %c4_i32_76 dim 1 : vector<16x128xf32>, i32 -> vector<16x128xf32>
    %294 = vector.shape_cast %43 : vector<1x128xi1> to vector<1x128xi1>
    %295 = vector.broadcast %294 : vector<1x128xi1> to vector<16x128xi1>
    %296 = arith.select %295, %293, %292 : vector<16x128xi1>, vector<16x128xf32>
    %297 = arith.addf %291, %296 : vector<16x128xf32>
    %c120_i32_77 = arith.constant 120 : i32
    %298 = tpu.dynamic_rotate %297 by %c120_i32_77 dim 1 : vector<16x128xf32>, i32 -> vector<16x128xf32>
    %c8_i32_78 = arith.constant 8 : i32
    %299 = tpu.dynamic_rotate %297 by %c8_i32_78 dim 1 : vector<16x128xf32>, i32 -> vector<16x128xf32>
    %300 = vector.shape_cast %47 : vector<1x128xi1> to vector<1x128xi1>
    %301 = vector.broadcast %300 : vector<1x128xi1> to vector<16x128xi1>
    %302 = arith.select %301, %299, %298 : vector<16x128xi1>, vector<16x128xf32>
    %303 = arith.addf %297, %302 : vector<16x128xf32>
    %304 = arith.divf %279, %303 : vector<16x128xf32>
    %c0_79 = arith.constant 0 : index
    %c0_80 = arith.constant 0 : index
    %c0_81 = arith.constant 0 : index
    %305 = vector.load %arg3[%c0_79, %c0_80, %c0_81] : memref<1x16x128xf32, #tpu.memory_space<vmem>>, vector<1x16x128xf32>
    %306 = vector.shape_cast %305 : vector<1x16x128xf32> to vector<16x128xf32>
    %307 = vector.shape_cast %304 : vector<16x128xf32> to vector<1x16x128xf32>
    tpu.vector_store %arg3[%c0_79, %c0_80, %c0_81], %307 {strides = array<i32>} : memref<1x16x128xf32, #tpu.memory_space<vmem>>, vector<1x16x128xf32>,
    return
  }
  func.func @transform_0(%arg0: i32, %arg1: memref<1xf32, #tpu.memory_space<smem>>) -> (i32, i32, i32) {
    %c0_i32 = arith.constant 0 : i32
    %c0_i32_0 = arith.constant 0 : i32
    %c0_i32_1 = arith.constant 0 : i32
    return %arg0, %c0_i32, %c0_i32_0 : i32, i32, i32
  }
  func.func @transform_1(%arg0: i32, %arg1: memref<1xf32, #tpu.memory_space<smem>>) -> (i32, i32, i32) {
    %c0_i32 = arith.constant 0 : i32
    %c0_i32_0 = arith.constant 0 : i32
    %c0_i32_1 = arith.constant 0 : i32
    return %arg0, %c0_i32, %c0_i32_0 : i32, i32, i32
  }
}

</mosaic_0001>

<bundles_post_ra>
// kernel: tpu_custom_call.1
= control target key start
LH: loop header
LB: loop body
LE: loop exit
PB: predicated region body
PF: predicated region fallthrough
CT: control target
= control target key end

     0   :  { %8 = vsyncpa [#allocation5], 0  ;;  %s1181_s0 = inlined_call_operand.<no memory space> [shape: f32[1], index: 0, kind: input, shape index: {}]   ;;  %s1182_s1 = inlined_call_operand.hbm [shape: f32[1,16,128], index: 1, kind: input, shape index: {}]   ;;  %s1183_s2 = inlined_call_operand.hbm [shape: f32[1,16,128], index: 2, kind: output, shape index: {}]  }
   0x1   :  { %9 = vsyncpa [#allocation6], 0  ;;  %s842_s9 = smov [#allocation4]   ;;  %s794_s13 = scalar_lea.hbm %s1182_s1, 256 }
   0x2   :  { %s15_s10 = sshll.u32 %s842_s9, 4  ;;  %p795_p0 = scmp.ne.s32.totalorder %s1182_s1, %s794_s13  ;;  %s16_s10 = int_to_ptr.vmem [resolvable:$true] %s15_s10 }
   0x3   :  { %p798_p1 = scmp.lt.u32.totalorder %s794_s13, %s1182_s1 }
   0x5   :  { %p800_p2 = pnand %p798_p1, %p795_p0 }
   0x7   :  { %803 = shalt.err (!%p800_p2)
}
   0x8   :  { %s804_s18 = scalar_lea.vmem %s16_s10, 256  ;;  %p809_p4 = scmp.lt.s32.totalorder %s16_s10, %s16_s10 }
   0x9   :  { %p805_p3 = scmp.ne.s32.totalorder %s16_s10, %s804_s18  ;;  %p810_p5 = scmp.lt.s32.totalorder %s804_s18, %s804_s18 }
   0xb   :  { %p811_p6 = por %p810_p5, %p809_p4 }
   0xd   :  { %p812_p7 = pnand %p811_p6, %p805_p3 }
   0xf   :  { %815 = shalt.err (!%p812_p7)
}
  0x10   :  { %s843_s19 = smov 128   ;;  %s844_s20 = smov 8  }
  0x11   :  { %21 = dma.hbm_to_vmem [thread:$0]  %s1182_s1, 256, %s16_s10, [#allocation5], %s843_s19, %s843_s19, %s844_s20  }
  0x12   :  { %838 = dma.done.wait [#allocation5], 256  }
  0x13   :  { %839 = vsyncadd [#allocation5], 4294967040  ;;  %v28_v0 = vstv %s1181_s0  ;;  %v26_v1 = vld [vmem:[#allocation4] sm:$0xff]  ;;  %v27_v2 = vld [vmem:[#allocation4 + $0x8] sm:$0xff]  ;;  %s845_s0 = smov 1   ;;  %s846_s1 = smov 127   ;;  %v55_v33 = vlaneseq }
  0x14   :  { %v29_v3 = vmul.f32 %v28_v0, %v26_v1  ;;  %v30_v4 = vmul.f32 %v28_v0, %v27_v2  ;;  %s847_s25 = smov 126   ;;  %s848_s26 = smov 2  }
  0x15   :  { %v56_v34 = vand.u32 127, %v55_v33  ;;  %s849_s27 = smov 124   ;;  %s850_s28 = smov 4  }
  0x16   :  { %v31_v5 = vmax.f32 %v29_v3, %v30_v4  ;;  %s851_s29 = smov 120   ;;  %s852_s30 = smov [#allocation7]  }
  0x17   :  { %v61_v35 = vand.u32 15, %v56_v34  ;;  %s659_s3 = sshll.u32 %s852_s30, 4  ;;  %s660_s3 = int_to_ptr.vmem [resolvable:$true] %s659_s3 }
  0x18   :  { %v32_v6 = vrot.slane %v31_v5, 4  ;;  %s816_s4 = scalar_lea.vmem %s660_s3, 256  ;;  %p821_p9 = scmp.lt.s32.totalorder %s660_s3, %s660_s3 }
  0x19   :  { %v69_v36 = vand.u32 1, %v61_v35  ;;  %v71_v46 = vand.u32 2, %v61_v35  ;;  %v73_v56 = vand.u32 4, %v61_v35  ;;  %v75_v2 = vand.u32 8, %v61_v35  ;;  %p817_p8 = scmp.ne.s32.totalorder %s660_s3, %s816_s4  ;;  %p822_p10 = scmp.lt.s32.totalorder %s816_s4, %s816_s4 }
  0x1a   :  { %v33_v7 = vmax.f32 %v31_v5, %v32_v6 }
  0x1b   :  { %vm896_vm0 = vcmp.ne.s32.totalorder %v69_v36, 0  ;;  %vm908_vm1 = vcmp.ne.s32.totalorder %v71_v46, 0  ;;  %vm920_vm2 = vcmp.ne.s32.totalorder %v73_v56, 0  ;;  %vm932_vm3 = vcmp.ne.s32.totalorder %v75_v2, 0  ;;  %p823_p11 = por %p822_p10, %p821_p9 }
  0x1c   :  { %v34_v8 = vrot.slane %v33_v7, 2 }
  0x1d   :  { %p824_p12 = pnand %p823_p11, %p817_p8 }
  0x1e   :  { %v35_v9 = vmax.f32 %v33_v7, %v34_v8 }
  0x20   :  { %v36_v10 = vrot.slane %v35_v9, 1 }
  0x22   :  { %v37_v11 = vmax.f32 %v35_v9, %v36_v10 }
  0x24   :  { %v38_v12 = vsub.f32 %v29_v3, %v37_v11  ;;  %v39_v13 = vsub.f32 %v30_v4, %v37_v11 }
  0x26   :  { %v40_v14 = vmul.f32 1.442695, %v38_v12  ;;  %v42_v15 = vmul.f32 1.442695, %v39_v13 }
  0x28   :  { %682 = vpow2.f32 %v40_v14 }
  0x29   :  { %684 = vpow2.f32 %v42_v15 }
  0x32   :  { %v683_v16 = vpop.eup %682 }
  0x33   :  { %v685_v17 = vpop.eup %684 }
  0x34   :  { %v44_v18 = vadd.f32 %v685_v17, %v683_v16 }
  0x36   :  { %v45_v19 = vrot.slane %v44_v18, 4 }
  0x38   :  { %v46_v20 = vadd.f32 %v45_v19, %v44_v18 }
  0x3a   :  { %v47_v21 = vrot.slane %v46_v20, 2 }
  0x3c   :  { %v48_v22 = vadd.f32 %v47_v21, %v46_v20 }
  0x3e   :  { %v49_v23 = vrot.slane %v48_v22, 1 }
  0x40   :  { %v50_v24 = vadd.f32 %v49_v23, %v48_v22 }
  0x42   :  { %686 = vlog2.f32 %v50_v24 }
  0x4c   :  { %v687_v25 = vpop.eup %686 }
  0x4d   :  { %v52_v26 = vmul.f32 0.6931472, %v687_v25 }
  0x4f   :  { %v886_v27 = vsub.f32 %v38_v12, %v52_v26  ;;  %v888_v28 = vsub.f32 %v39_v13, %v52_v26 }
  0x51   :  { %v77_v29 = vmul.f32 1.442695, %v886_v27  ;;  %v79_v30 = vmul.f32 1.442695, %v888_v28 }
  0x53   :  { %688 = vpow2.f32 %v77_v29 }
  0x54   :  { %690 = vpow2.f32 %v79_v30 }
  0x5d   :  { %v689_v31 = vpop.eup %688 }
  0x5e   :  { %85 = vrot.lane.b32.xlu1 %v689_v31, %s845_s0  ;;  %81 = vrot.lane.b32.xlu0 %v689_v31, %s846_s1  ;;  %v691_v32 = vpop.eup %690 }
  0x62   :  { %87 = vrot.lane.b32.xlu1 %v691_v32, %s845_s0  ;;  %83 = vrot.lane.b32.xlu0 %v691_v32, %s846_s1 }
  0xd0   :  { %v86_v38 = vpop.permute.xlu1 %85  ;;  %v82_v39 = vpop.permute.xlu0 %81 }
  0xd1   :  { %v91_v40 = vsel %vm896_vm0, %v86_v38, %v82_v39 }
  0xd2   :  { %v93_v41 = vadd.f32 %v689_v31, %v91_v40 }
  0xd4   :  { %v88_v42 = vpop.permute.xlu1 %87  ;;  %95 = vrot.lane.b32.xlu0 %v93_v41, %s847_s25  ;;  %v84_v43 = vpop.permute.xlu0 %83 }
  0xd5   :  { %v92_v44 = vsel %vm896_vm0, %v88_v42, %v84_v43 }
  0xd6   :  { %v94_v45 = vadd.f32 %v691_v32, %v92_v44 }
  0xd8   :  { %99 = vrot.lane.b32.xlu0 %v93_v41, %s848_s26  ;;  %97 = vrot.lane.b32.xlu1 %v94_v45, %s847_s25 }
  0xdc   :  { %101 = vrot.lane.b32.xlu1 %v94_v45, %s848_s26 }
 0x146   :  { %v96_v47 = vpop.permute.xlu0 %95 }
 0x14a   :  { %v98_v49 = vpop.permute.xlu1 %97  ;;  %v100_v50 = vpop.permute.xlu0 %99 }
 0x14b   :  { %v105_v51 = vsel %vm908_vm1, %v100_v50, %v96_v47 }
 0x14c   :  { %v107_v52 = vadd.f32 %v105_v51, %v93_v41 }
 0x14e   :  { %v102_v53 = vpop.permute.xlu1 %101  ;;  %109 = vrot.lane.b32.xlu0 %v107_v52, %s849_s27 }
 0x14f   :  { %v106_v54 = vsel %vm908_vm1, %v102_v53, %v98_v49 }
 0x150   :  { %v108_v55 = vadd.f32 %v106_v54, %v94_v45 }
 0x152   :  { %111 = vrot.lane.b32.xlu1 %v108_v55, %s849_s27  ;;  %113 = vrot.lane.b32.xlu0 %v107_v52, %s850_s28 }
 0x156   :  { %115 = vrot.lane.b32.xlu1 %v108_v55, %s850_s28 }
 0x1c0   :  { %v110_v57 = vpop.permute.xlu0 %109 }
 0x1c4   :  { %v112_v59 = vpop.permute.xlu1 %111  ;;  %v114_v60 = vpop.permute.xlu0 %113 }
 0x1c5   :  { %v119_v61 = vsel %vm920_vm2, %v114_v60, %v110_v57 }
 0x1c6   :  { %v121_v62 = vadd.f32 %v119_v61, %v107_v52 }
 0x1c8   :  { %v116_v63 = vpop.permute.xlu1 %115  ;;  %123 = vrot.lane.b32.xlu0 %v121_v62, %s851_s29 }
 0x1c9   :  { %v120_v0 = vsel %vm920_vm2, %v116_v63, %v112_v59 }
 0x1ca   :  { %v122_v1 = vadd.f32 %v120_v0, %v108_v55 }
 0x1cc   :  { %125 = vrot.lane.b32.xlu1 %v122_v1, %s851_s29  ;;  %127 = vrot.lane.b32.xlu0 %v121_v62, %s844_s20 }
 0x1d0   :  { %129 = vrot.lane.b32.xlu1 %v122_v1, %s844_s20 }
 0x23a   :  { %v124_v3 = vpop.permute.xlu0 %123 }
 0x23e   :  { %v126_v5 = vpop.permute.xlu1 %125  ;;  %v128_v6 = vpop.permute.xlu0 %127 }
 0x23f   :  { %v133_v7 = vsel %vm932_vm3, %v128_v6, %v124_v3 }
 0x240   :  { %v135_v8 = vadd.f32 %v133_v7, %v121_v62 }
 0x242   :  { %692 = vlog2.f32 %v135_v8  ;;  %v130_v9 = vpop.permute.xlu1 %129 }
 0x243   :  { %v134_v10 = vsel %vm932_vm3, %v130_v9, %v126_v5 }
 0x244   :  { %v136_v11 = vadd.f32 %v134_v10, %v122_v1 }
 0x246   :  { %694 = vlog2.f32 %v136_v11 }
 0x24c   :  { %v693_v12 = vpop.eup %692 }
 0x24d   :  { %v138_v13 = vmul.f32 0.6931472, %v693_v12 }
 0x24f   :  { %v141_v14 = vsub.f32 %v886_v27, %v138_v13 }
 0x250   :  { %v695_v15 = vpop.eup %694 }
 0x251   :  { %v140_v16 = vmul.f32 0.6931472, %v695_v15  ;;  %v143_v17 = vmul.f32 1.442695, %v141_v14 }
 0x253   :  { %v142_v18 = vsub.f32 %v888_v28, %v140_v16  ;;  %696 = vpow2.f32 %v143_v17 }
 0x255   :  { %v145_v19 = vmul.f32 1.442695, %v142_v18 }
 0x257   :  { %698 = vpow2.f32 %v145_v19 }
 0x25d   :  { %v697_v20 = vpop.eup %696 }
 0x261   :  { %v699_v21 = vpop.eup %698 }
 0x262   :  { %v147_v22 = vadd.f32 %v699_v21, %v697_v20 }
 0x264   :  { %v148_v23 = vrot.slane %v147_v22, 4 }
 0x266   :  { %v149_v24 = vadd.f32 %v148_v23, %v147_v22 }
 0x268   :  { %v150_v25 = vrot.slane %v149_v24, 2 }
 0x26a   :  { %v151_v26 = vadd.f32 %v150_v25, %v149_v24 }
 0x26c   :  { %v152_v29 = vrot.slane %v151_v26, 1 }
 0x26e   :  { %v153_v30 = vadd.f32 %v152_v29, %v151_v26 }
 0x270   :  { %700 = vlog2.f32 %v153_v30 }
 0x27a   :  { %v701_v31 = vpop.eup %700 }
 0x27b   :  { %v155_v27 = vmul.f32 0.6931472, %v701_v31 }
 0x27d   :  { %v156_v32 = vsub.f32 %v141_v14, %v155_v27  ;;  %v157_v33 = vsub.f32 %v142_v18, %v155_v27 }
 0x27f   :  { %v158_v34 = vmul.f32 1.442695, %v156_v32  ;;  %v160_v35 = vmul.f32 1.442695, %v157_v33 }
 0x281   :  { %702 = vpow2.f32 %v158_v34 }
 0x282   :  { %704 = vpow2.f32 %v160_v35 }
 0x28b   :  { %v703_v28 = vpop.eup %702 }
 0x28c   :  { %v705_v36 = vpop.eup %704  ;;  %162 = vrot.lane.b32.xlu0 %v703_v28, %s846_s1 }
 0x28d   :  { %164 = vrot.lane.b32.xlu1 %v705_v36, %s846_s1 }
 0x290   :  { %166 = vrot.lane.b32.xlu0 %v703_v28, %s845_s0 }
 0x291   :  { %168 = vrot.lane.b32.xlu1 %v705_v36, %s845_s0 }
 0x2fe   :  { %v163_v38 = vpop.permute.xlu0 %162 }
 0x2ff   :  { %v165_v39 = vpop.permute.xlu1 %164 }
 0x302   :  { %v167_v40 = vpop.permute.xlu0 %166 }
 0x303   :  { %v169_v41 = vpop.permute.xlu1 %168  ;;  %v170_v42 = vsel %vm896_vm0, %v167_v40, %v163_v38 }
 0x304   :  { %v171_v43 = vsel %vm896_vm0, %v169_v41, %v165_v39  ;;  %v172_v44 = vadd.f32 %v703_v28, %v170_v42 }
 0x305   :  { %v173_v45 = vadd.f32 %v705_v36, %v171_v43 }
 0x306   :  { %174 = vrot.lane.b32.xlu0 %v172_v44, %s847_s25 }
 0x307   :  { %176 = vrot.lane.b32.xlu1 %v173_v45, %s847_s25 }
 0x30a   :  { %178 = vrot.lane.b32.xlu0 %v172_v44, %s848_s26 }
 0x30b   :  { %180 = vrot.lane.b32.xlu1 %v173_v45, %s848_s26 }
 0x378   :  { %v175_v46 = vpop.permute.xlu0 %174 }
 0x379   :  { %v177_v47 = vpop.permute.xlu1 %176 }
 0x37c   :  { %v179_v49 = vpop.permute.xlu0 %178 }
 0x37d   :  { %v181_v50 = vpop.permute.xlu1 %180  ;;  %v182_v51 = vsel %vm908_vm1, %v179_v49, %v175_v46 }
 0x37e   :  { %v183_v52 = vsel %vm908_vm1, %v181_v50, %v177_v47  ;;  %v184_v53 = vadd.f32 %v182_v51, %v172_v44 }
 0x37f   :  { %v185_v54 = vadd.f32 %v183_v52, %v173_v45 }
 0x380   :  { %186 = vrot.lane.b32.xlu0 %v184_v53, %s849_s27 }
 0x381   :  { %188 = vrot.lane.b32.xlu1 %v185_v54, %s849_s27 }
 0x384   :  { %190 = vrot.lane.b32.xlu0 %v184_v53, %s850_s28 }
 0x385   :  { %192 = vrot.lane.b32.xlu1 %v185_v54, %s850_s28 }
 0x3f2   :  { %v187_v55 = vpop.permute.xlu0 %186 }
 0x3f3   :  { %v189_v56 = vpop.permute.xlu1 %188 }
 0x3f6   :  { %v191_v57 = vpop.permute.xlu0 %190 }
 0x3f7   :  { %v193_v59 = vpop.permute.xlu1 %192  ;;  %v194_v60 = vsel %vm920_vm2, %v191_v57, %v187_v55 }
 0x3f8   :  { %v195_v61 = vsel %vm920_vm2, %v193_v59, %v189_v56  ;;  %v196_v62 = vadd.f32 %v194_v60, %v184_v53 }
 0x3f9   :  { %v197_v63 = vadd.f32 %v195_v61, %v185_v54 }
 0x3fa   :  { %198 = vrot.lane.b32.xlu0 %v196_v62, %s851_s29 }
 0x3fb   :  { %200 = vrot.lane.b32.xlu1 %v197_v63, %s851_s29 }
 0x3fe   :  { %202 = vrot.lane.b32.xlu0 %v196_v62, %s844_s20 }
 0x3ff   :  { %204 = vrot.lane.b32.xlu1 %v197_v63, %s844_s20 }
 0x46c   :  { %v199_v0 = vpop.permute.xlu0 %198 }
 0x46d   :  { %v201_v1 = vpop.permute.xlu1 %200 }
 0x470   :  { %v203_v2 = vpop.permute.xlu0 %202 }
 0x471   :  { %v205_v3 = vpop.permute.xlu1 %204  ;;  %v206_v5 = vsel %vm932_vm3, %v203_v2, %v199_v0 }
 0x472   :  { %v207_v6 = vsel %vm932_vm3, %v205_v3, %v201_v1  ;;  %v208_v7 = vadd.f32 %v206_v5, %v196_v62 }
 0x473   :  { %v209_v8 = vadd.f32 %v207_v6, %v197_v63 }
 0x474   :  { %706 = vlog2.f32 %v208_v7 }
 0x475   :  { %708 = vlog2.f32 %v209_v8 }
 0x47e   :  { %v707_v9 = vpop.eup %706 }
 0x47f   :  { %v709_v10 = vpop.eup %708  ;;  %v211_v11 = vmul.f32 0.6931472, %v707_v9 }
 0x480   :  { %v213_v12 = vmul.f32 0.6931472, %v709_v10 }
 0x481   :  { %v214_v13 = vsub.f32 %v156_v32, %v211_v11 }
 0x482   :  { %v215_v14 = vsub.f32 %v157_v33, %v213_v12 }
 0x483   :  { %v216_v15 = vmul.f32 1.442695, %v214_v13 }
 0x484   :  { %v218_v16 = vmul.f32 1.442695, %v215_v14 }
 0x485   :  { %710 = vpow2.f32 %v216_v15 }
 0x486   :  { %712 = vpow2.f32 %v218_v16 }
 0x48f   :  { %v711_v17 = vpop.eup %710 }
 0x490   :  { %v713_v18 = vpop.eup %712 }
 0x491   :  { %v220_v19 = vadd.f32 %v713_v18, %v711_v17 }
 0x493   :  { %v221_v20 = vrot.slane %v220_v19, 4 }
 0x495   :  { %v222_v21 = vadd.f32 %v221_v20, %v220_v19 }
 0x497   :  { %v223_v22 = vrot.slane %v222_v21, 2 }
 0x499   :  { %v224_v23 = vadd.f32 %v223_v22, %v222_v21 }
 0x49b   :  { %v225_v24 = vrot.slane %v224_v23, 1 }
 0x49d   :  { %v226_v25 = vadd.f32 %v225_v24, %v224_v23 }
 0x49f   :  { %714 = vlog2.f32 %v226_v25 }
 0x4a9   :  { %v715_v26 = vpop.eup %714 }
 0x4aa   :  { %v228_v29 = vmul.f32 0.6931472, %v715_v26 }
 0x4ac   :  { %v229_v30 = vsub.f32 %v214_v13, %v228_v29  ;;  %v230_v31 = vsub.f32 %v215_v14, %v228_v29 }
 0x4ae   :  { %v231_v27 = vmul.f32 1.442695, %v229_v30  ;;  %v233_v32 = vmul.f32 1.442695, %v230_v31 }
 0x4b0   :  { %716 = vpow2.f32 %v231_v27 }
 0x4b1   :  { %718 = vpow2.f32 %v233_v32 }
 0x4ba   :  { %v717_v33 = vpop.eup %716 }
 0x4bb   :  { %v719_v34 = vpop.eup %718  ;;  %235 = vrot.lane.b32.xlu0 %v717_v33, %s846_s1 }
 0x4bc   :  { %237 = vrot.lane.b32.xlu1 %v719_v34, %s846_s1 }
 0x4bf   :  { %239 = vrot.lane.b32.xlu0 %v717_v33, %s845_s0 }
 0x4c0   :  { %241 = vrot.lane.b32.xlu1 %v719_v34, %s845_s0 }
 0x52d   :  { %v236_v35 = vpop.permute.xlu0 %235 }
 0x52e   :  { %v238_v28 = vpop.permute.xlu1 %237 }
 0x531   :  { %v240_v36 = vpop.permute.xlu0 %239 }
 0x532   :  { %v242_v38 = vpop.permute.xlu1 %241  ;;  %v243_v39 = vsel %vm896_vm0, %v240_v36, %v236_v35 }
 0x533   :  { %v244_v40 = vsel %vm896_vm0, %v242_v38, %v238_v28  ;;  %v245_v41 = vadd.f32 %v717_v33, %v243_v39 }
 0x534   :  { %v246_v42 = vadd.f32 %v719_v34, %v244_v40 }
 0x535   :  { %247 = vrot.lane.b32.xlu0 %v245_v41, %s847_s25 }
 0x536   :  { %249 = vrot.lane.b32.xlu1 %v246_v42, %s847_s25 }
 0x539   :  { %251 = vrot.lane.b32.xlu0 %v245_v41, %s848_s26 }
 0x53a   :  { %253 = vrot.lane.b32.xlu1 %v246_v42, %s848_s26 }
 0x5a7   :  { %v248_v43 = vpop.permute.xlu0 %247 }
 0x5a8   :  { %v250_v44 = vpop.permute.xlu1 %249 }
 0x5ab   :  { %v252_v45 = vpop.permute.xlu0 %251 }
 0x5ac   :  { %v254_v46 = vpop.permute.xlu1 %253  ;;  %v255_v47 = vsel %vm908_vm1, %v252_v45, %v248_v43 }
 0x5ad   :  { %v256_v49 = vsel %vm908_vm1, %v254_v46, %v250_v44  ;;  %v257_v50 = vadd.f32 %v255_v47, %v245_v41 }
 0x5ae   :  { %v258_v51 = vadd.f32 %v256_v49, %v246_v42 }
 0x5af   :  { %259 = vrot.lane.b32.xlu0 %v257_v50, %s849_s27 }
 0x5b0   :  { %261 = vrot.lane.b32.xlu1 %v258_v51, %s849_s27 }
 0x5b3   :  { %263 = vrot.lane.b32.xlu0 %v257_v50, %s850_s28 }
 0x5b4   :  { %265 = vrot.lane.b32.xlu1 %v258_v51, %s850_s28 }
 0x621   :  { %v260_v52 = vpop.permute.xlu0 %259 }
 0x622   :  { %v262_v53 = vpop.permute.xlu1 %261 }
 0x625   :  { %v264_v54 = vpop.permute.xlu0 %263 }
 0x626   :  { %v266_v55 = vpop.permute.xlu1 %265  ;;  %v267_v56 = vsel %vm920_vm2, %v264_v54, %v260_v52 }
 0x627   :  { %v268_v57 = vsel %vm920_vm2, %v266_v55, %v262_v53  ;;  %v269_v59 = vadd.f32 %v267_v56, %v257_v50 }
 0x628   :  { %v270_v60 = vadd.f32 %v268_v57, %v258_v51 }
 0x629   :  { %271 = vrot.lane.b32.xlu0 %v269_v59, %s851_s29 }
 0x62a   :  { %273 = vrot.lane.b32.xlu1 %v270_v60, %s851_s29 }
 0x62d   :  { %275 = vrot.lane.b32.xlu0 %v269_v59, %s844_s20 }
 0x62e   :  { %277 = vrot.lane.b32.xlu1 %v270_v60, %s844_s20 }
 0x69b   :  { %v272_v61 = vpop.permute.xlu0 %271 }
 0x69c   :  { %v274_v62 = vpop.permute.xlu1 %273 }
 0x69f   :  { %v276_v63 = vpop.permute.xlu0 %275 }
 0x6a0   :  { %v278_v0 = vpop.permute.xlu1 %277  ;;  %v279_v1 = vsel %vm932_vm3, %v276_v63, %v272_v61 }
 0x6a1   :  { %v280_v2 = vsel %vm932_vm3, %v278_v0, %v274_v62  ;;  %v281_v3 = vadd.f32 %v279_v1, %v269_v59 }
 0x6a2   :  { %v282_v5 = vadd.f32 %v280_v2, %v270_v60 }
 0x6a3   :  { %720 = vlog2.f32 %v281_v3 }
 0x6a4   :  { %722 = vlog2.f32 %v282_v5 }
 0x6ad   :  { %v721_v6 = vpop.eup %720 }
 0x6ae   :  { %v723_v7 = vpop.eup %722  ;;  %v284_v8 = vmul.f32 0.6931472, %v721_v6 }
 0x6af   :  { %v286_v9 = vmul.f32 0.6931472, %v723_v7 }
 0x6b0   :  { %v287_v10 = vsub.f32 %v229_v30, %v284_v8 }
 0x6b1   :  { %v288_v11 = vsub.f32 %v230_v31, %v286_v9 }
 0x6b2   :  { %v289_v12 = vmul.f32 1.442695, %v287_v10 }
 0x6b3   :  { %v291_v13 = vmul.f32 1.442695, %v288_v11 }
 0x6b4   :  { %724 = vpow2.f32 %v289_v12 }
 0x6b5   :  { %726 = vpow2.f32 %v291_v13 }
 0x6be   :  { %v725_v14 = vpop.eup %724 }
 0x6bf   :  { %v727_v15 = vpop.eup %726 }
 0x6c0   :  { %v293_v16 = vadd.f32 %v727_v15, %v725_v14 }
 0x6c2   :  { %v294_v17 = vrot.slane %v293_v16, 4 }
 0x6c4   :  { %v295_v18 = vadd.f32 %v294_v17, %v293_v16 }
 0x6c6   :  { %v296_v19 = vrot.slane %v295_v18, 2 }
 0x6c8   :  { %v297_v20 = vadd.f32 %v296_v19, %v295_v18 }
 0x6ca   :  { %v298_v21 = vrot.slane %v297_v20, 1 }
 0x6cc   :  { %v299_v22 = vadd.f32 %v298_v21, %v297_v20 }
 0x6ce   :  { %728 = vlog2.f32 %v299_v22 }
 0x6d8   :  { %v729_v23 = vpop.eup %728 }
 0x6d9   :  { %v301_v24 = vmul.f32 0.6931472, %v729_v23 }
 0x6db   :  { %v302_v25 = vsub.f32 %v287_v10, %v301_v24  ;;  %v303_v26 = vsub.f32 %v288_v11, %v301_v24 }
 0x6dd   :  { %v304_v29 = vmul.f32 1.442695, %v302_v25  ;;  %v306_v30 = vmul.f32 1.442695, %v303_v26 }
 0x6df   :  { %730 = vpow2.f32 %v304_v29 }
 0x6e0   :  { %732 = vpow2.f32 %v306_v30 }
 0x6e9   :  { %v731_v31 = vpop.eup %730 }
 0x6ea   :  { %v733_v27 = vpop.eup %732  ;;  %308 = vrot.lane.b32.xlu0 %v731_v31, %s846_s1 }
 0x6eb   :  { %310 = vrot.lane.b32.xlu1 %v733_v27, %s846_s1 }
 0x6ee   :  { %312 = vrot.lane.b32.xlu0 %v731_v31, %s845_s0 }
 0x6ef   :  { %314 = vrot.lane.b32.xlu1 %v733_v27, %s845_s0 }
 0x75c   :  { %v309_v32 = vpop.permute.xlu0 %308 }
 0x75d   :  { %v311_v33 = vpop.permute.xlu1 %310 }
 0x760   :  { %v313_v34 = vpop.permute.xlu0 %312 }
 0x761   :  { %v315_v35 = vpop.permute.xlu1 %314  ;;  %v316_v28 = vsel %vm896_vm0, %v313_v34, %v309_v32 }
 0x762   :  { %v317_v36 = vsel %vm896_vm0, %v315_v35, %v311_v33  ;;  %v318_v38 = vadd.f32 %v731_v31, %v316_v28 }
 0x763   :  { %v319_v39 = vadd.f32 %v733_v27, %v317_v36 }
 0x764   :  { %320 = vrot.lane.b32.xlu0 %v318_v38, %s847_s25 }
 0x765   :  { %322 = vrot.lane.b32.xlu1 %v319_v39, %s847_s25 }
 0x768   :  { %324 = vrot.lane.b32.xlu0 %v318_v38, %s848_s26 }
 0x769   :  { %326 = vrot.lane.b32.xlu1 %v319_v39, %s848_s26 }
 0x7d6   :  { %v321_v40 = vpop.permute.xlu0 %320 }
 0x7d7   :  { %v323_v41 = vpop.permute.xlu1 %322 }
 0x7da   :  { %v325_v42 = vpop.permute.xlu0 %324 }
 0x7db   :  { %v327_v43 = vpop.permute.xlu1 %326  ;;  %v328_v44 = vsel %vm908_vm1, %v325_v42, %v321_v40 }
 0x7dc   :  { %v329_v45 = vsel %vm908_vm1, %v327_v43, %v323_v41  ;;  %v330_v46 = vadd.f32 %v328_v44, %v318_v38 }
 0x7dd   :  { %v331_v47 = vadd.f32 %v329_v45, %v319_v39 }
 0x7de   :  { %332 = vrot.lane.b32.xlu0 %v330_v46, %s849_s27 }
 0x7df   :  { %334 = vrot.lane.b32.xlu1 %v331_v47, %s849_s27 }
 0x7e2   :  { %336 = vrot.lane.b32.xlu0 %v330_v46, %s850_s28 }
 0x7e3   :  { %338 = vrot.lane.b32.xlu1 %v331_v47, %s850_s28 }
 0x850   :  { %v333_v49 = vpop.permute.xlu0 %332 }
 0x851   :  { %v335_v50 = vpop.permute.xlu1 %334 }
 0x854   :  { %v337_v51 = vpop.permute.xlu0 %336 }
 0x855   :  { %v339_v52 = vpop.permute.xlu1 %338  ;;  %v340_v53 = vsel %vm920_vm2, %v337_v51, %v333_v49 }
 0x856   :  { %v341_v54 = vsel %vm920_vm2, %v339_v52, %v335_v50  ;;  %v342_v55 = vadd.f32 %v340_v53, %v330_v46 }
 0x857   :  { %v343_v56 = vadd.f32 %v341_v54, %v331_v47 }
 0x858   :  { %344 = vrot.lane.b32.xlu0 %v342_v55, %s851_s29 }
 0x859   :  { %346 = vrot.lane.b32.xlu1 %v343_v56, %s851_s29 }
 0x85c   :  { %348 = vrot.lane.b32.xlu0 %v342_v55, %s844_s20 }
 0x85d   :  { %350 = vrot.lane.b32.xlu1 %v343_v56, %s844_s20 }
 0x8ca   :  { %v345_v57 = vpop.permute.xlu0 %344 }
 0x8cb   :  { %v347_v59 = vpop.permute.xlu1 %346 }
 0x8ce   :  { %v349_v60 = vpop.permute.xlu0 %348 }
 0x8cf   :  { %v351_v61 = vpop.permute.xlu1 %350  ;;  %v352_v62 = vsel %vm932_vm3, %v349_v60, %v345_v57 }
 0x8d0   :  { %v353_v63 = vsel %vm932_vm3, %v351_v61, %v347_v59  ;;  %v354_v0 = vadd.f32 %v352_v62, %v342_v55 }
 0x8d1   :  { %v355_v1 = vadd.f32 %v353_v63, %v343_v56 }
 0x8d2   :  { %734 = vlog2.f32 %v354_v0 }
 0x8d3   :  { %736 = vlog2.f32 %v355_v1 }
 0x8dc   :  { %v735_v2 = vpop.eup %734 }
 0x8dd   :  { %v737_v3 = vpop.eup %736  ;;  %v357_v5 = vmul.f32 0.6931472, %v735_v2 }
 0x8de   :  { %v359_v6 = vmul.f32 0.6931472, %v737_v3 }
 0x8df   :  { %v360_v7 = vsub.f32 %v302_v25, %v357_v5 }
 0x8e0   :  { %v361_v8 = vsub.f32 %v303_v26, %v359_v6 }
 0x8e1   :  { %v362_v9 = vmul.f32 1.442695, %v360_v7 }
 0x8e2   :  { %v364_v10 = vmul.f32 1.442695, %v361_v8 }
 0x8e3   :  { %738 = vpow2.f32 %v362_v9 }
 0x8e4   :  { %740 = vpow2.f32 %v364_v10 }
 0x8ed   :  { %v739_v11 = vpop.eup %738 }
 0x8ee   :  { %v741_v12 = vpop.eup %740 }
 0x8ef   :  { %v366_v13 = vadd.f32 %v741_v12, %v739_v11 }
 0x8f1   :  { %v367_v14 = vrot.slane %v366_v13, 4 }
 0x8f3   :  { %v368_v15 = vadd.f32 %v367_v14, %v366_v13 }
 0x8f5   :  { %v369_v16 = vrot.slane %v368_v15, 2 }
 0x8f7   :  { %v370_v17 = vadd.f32 %v369_v16, %v368_v15 }
 0x8f9   :  { %v371_v18 = vrot.slane %v370_v17, 1 }
 0x8fb   :  { %v372_v19 = vadd.f32 %v371_v18, %v370_v17 }
 0x8fd   :  { %742 = vlog2.f32 %v372_v19 }
 0x907   :  { %v743_v20 = vpop.eup %742 }
 0x908   :  { %v374_v21 = vmul.f32 0.6931472, %v743_v20 }
 0x90a   :  { %v375_v22 = vsub.f32 %v360_v7, %v374_v21  ;;  %v376_v23 = vsub.f32 %v361_v8, %v374_v21 }
 0x90c   :  { %v377_v24 = vmul.f32 1.442695, %v375_v22  ;;  %v379_v25 = vmul.f32 1.442695, %v376_v23 }
 0x90e   :  { %744 = vpow2.f32 %v377_v24 }
 0x90f   :  { %746 = vpow2.f32 %v379_v25 }
 0x918   :  { %v745_v26 = vpop.eup %744 }
 0x919   :  { %v747_v29 = vpop.eup %746  ;;  %381 = vrot.lane.b32.xlu0 %v745_v26, %s846_s1 }
 0x91a   :  { %383 = vrot.lane.b32.xlu1 %v747_v29, %s846_s1 }
 0x91d   :  { %385 = vrot.lane.b32.xlu0 %v745_v26, %s845_s0 }
 0x91e   :  { %387 = vrot.lane.b32.xlu1 %v747_v29, %s845_s0 }
 0x98b   :  { %v382_v30 = vpop.permute.xlu0 %381 }
 0x98c   :  { %v384_v31 = vpop.permute.xlu1 %383 }
 0x98f   :  { %v386_v27 = vpop.permute.xlu0 %385 }
 0x990   :  { %v388_v32 = vpop.permute.xlu1 %387  ;;  %v389_v33 = vsel %vm896_vm0, %v386_v27, %v382_v30 }
 0x991   :  { %v390_v34 = vsel %vm896_vm0, %v388_v32, %v384_v31  ;;  %v391_v35 = vadd.f32 %v745_v26, %v389_v33 }
 0x992   :  { %v392_v28 = vadd.f32 %v747_v29, %v390_v34 }
 0x993   :  { %393 = vrot.lane.b32.xlu0 %v391_v35, %s847_s25 }
 0x994   :  { %395 = vrot.lane.b32.xlu1 %v392_v28, %s847_s25 }
 0x997   :  { %397 = vrot.lane.b32.xlu0 %v391_v35, %s848_s26 }
 0x998   :  { %399 = vrot.lane.b32.xlu1 %v392_v28, %s848_s26 }
 0xa05   :  { %v394_v36 = vpop.permute.xlu0 %393 }
 0xa06   :  { %v396_v38 = vpop.permute.xlu1 %395 }
 0xa09   :  { %v398_v39 = vpop.permute.xlu0 %397 }
 0xa0a   :  { %v400_v40 = vpop.permute.xlu1 %399  ;;  %v401_v41 = vsel %vm908_vm1, %v398_v39, %v394_v36 }
 0xa0b   :  { %v402_v42 = vsel %vm908_vm1, %v400_v40, %v396_v38  ;;  %v403_v43 = vadd.f32 %v401_v41, %v391_v35 }
 0xa0c   :  { %v404_v44 = vadd.f32 %v402_v42, %v392_v28 }
 0xa0d   :  { %405 = vrot.lane.b32.xlu0 %v403_v43, %s849_s27 }
 0xa0e   :  { %407 = vrot.lane.b32.xlu1 %v404_v44, %s849_s27 }
 0xa11   :  { %409 = vrot.lane.b32.xlu0 %v403_v43, %s850_s28 }
 0xa12   :  { %411 = vrot.lane.b32.xlu1 %v404_v44, %s850_s28 }
 0xa7f   :  { %v406_v45 = vpop.permute.xlu0 %405 }
 0xa80   :  { %v408_v46 = vpop.permute.xlu1 %407 }
 0xa83   :  { %v410_v47 = vpop.permute.xlu0 %409 }
 0xa84   :  { %v412_v49 = vpop.permute.xlu1 %411  ;;  %v413_v50 = vsel %vm920_vm2, %v410_v47, %v406_v45 }
 0xa85   :  { %v414_v51 = vsel %vm920_vm2, %v412_v49, %v408_v46  ;;  %v415_v52 = vadd.f32 %v413_v50, %v403_v43 }
 0xa86   :  { %v416_v53 = vadd.f32 %v414_v51, %v404_v44 }
 0xa87   :  { %417 = vrot.lane.b32.xlu0 %v415_v52, %s851_s29 }
 0xa88   :  { %419 = vrot.lane.b32.xlu1 %v416_v53, %s851_s29 }
 0xa8b   :  { %421 = vrot.lane.b32.xlu0 %v415_v52, %s844_s20 }
 0xa8c   :  { %423 = vrot.lane.b32.xlu1 %v416_v53, %s844_s20 }
 0xaf9   :  { %v418_v54 = vpop.permute.xlu0 %417 }
 0xafa   :  { %v420_v55 = vpop.permute.xlu1 %419 }
 0xafd   :  { %v422_v56 = vpop.permute.xlu0 %421 }
 0xafe   :  { %v424_v57 = vpop.permute.xlu1 %423  ;;  %v425_v59 = vsel %vm932_vm3, %v422_v56, %v418_v54 }
 0xaff   :  { %v426_v60 = vsel %vm932_vm3, %v424_v57, %v420_v55  ;;  %v427_v61 = vadd.f32 %v425_v59, %v415_v52 }
 0xb00   :  { %v428_v62 = vadd.f32 %v426_v60, %v416_v53 }
 0xb01   :  { %748 = vlog2.f32 %v427_v61 }
 0xb02   :  { %750 = vlog2.f32 %v428_v62 }
 0xb0b   :  { %v749_v63 = vpop.eup %748 }
 0xb0c   :  { %v751_v0 = vpop.eup %750  ;;  %v430_v1 = vmul.f32 0.6931472, %v749_v63 }
 0xb0d   :  { %v432_v2 = vmul.f32 0.6931472, %v751_v0 }
 0xb0e   :  { %v433_v3 = vsub.f32 %v375_v22, %v430_v1 }
 0xb0f   :  { %v434_v5 = vsub.f32 %v376_v23, %v432_v2 }
 0xb10   :  { %v435_v6 = vmul.f32 1.442695, %v433_v3 }
 0xb11   :  { %v437_v7 = vmul.f32 1.442695, %v434_v5 }
 0xb12   :  { %752 = vpow2.f32 %v435_v6 }
 0xb13   :  { %754 = vpow2.f32 %v437_v7 }
 0xb1c   :  { %v753_v8 = vpop.eup %752 }
 0xb1d   :  { %v755_v9 = vpop.eup %754 }
 0xb1e   :  { %v439_v10 = vadd.f32 %v755_v9, %v753_v8 }
 0xb20   :  { %v440_v11 = vrot.slane %v439_v10, 4 }
 0xb22   :  { %v441_v12 = vadd.f32 %v440_v11, %v439_v10 }
 0xb24   :  { %v442_v13 = vrot.slane %v441_v12, 2 }
 0xb26   :  { %v443_v14 = vadd.f32 %v442_v13, %v441_v12 }
 0xb28   :  { %v444_v15 = vrot.slane %v443_v14, 1 }
 0xb2a   :  { %v445_v16 = vadd.f32 %v444_v15, %v443_v14 }
 0xb2c   :  { %756 = vlog2.f32 %v445_v16 }
 0xb36   :  { %v757_v17 = vpop.eup %756 }
 0xb37   :  { %v447_v18 = vmul.f32 0.6931472, %v757_v17 }
 0xb39   :  { %v448_v19 = vsub.f32 %v433_v3, %v447_v18  ;;  %v449_v20 = vsub.f32 %v434_v5, %v447_v18 }
 0xb3b   :  { %v450_v21 = vmul.f32 1.442695, %v448_v19  ;;  %v452_v22 = vmul.f32 1.442695, %v449_v20 }
 0xb3d   :  { %758 = vpow2.f32 %v450_v21 }
 0xb3e   :  { %760 = vpow2.f32 %v452_v22 }
 0xb47   :  { %v759_v23 = vpop.eup %758 }
 0xb48   :  { %v761_v24 = vpop.eup %760  ;;  %454 = vrot.lane.b32.xlu0 %v759_v23, %s846_s1 }
 0xb49   :  { %456 = vrot.lane.b32.xlu1 %v761_v24, %s846_s1 }
 0xb4c   :  { %458 = vrot.lane.b32.xlu0 %v759_v23, %s845_s0 }
 0xb4d   :  { %460 = vrot.lane.b32.xlu1 %v761_v24, %s845_s0 }
 0xbba   :  { %v455_v25 = vpop.permute.xlu0 %454 }
 0xbbb   :  { %v457_v26 = vpop.permute.xlu1 %456 }
 0xbbe   :  { %v459_v29 = vpop.permute.xlu0 %458 }
 0xbbf   :  { %v461_v30 = vpop.permute.xlu1 %460  ;;  %v462_v31 = vsel %vm896_vm0, %v459_v29, %v455_v25 }
 0xbc0   :  { %v463_v27 = vsel %vm896_vm0, %v461_v30, %v457_v26  ;;  %v464_v32 = vadd.f32 %v759_v23, %v462_v31 }
 0xbc1   :  { %v465_v33 = vadd.f32 %v761_v24, %v463_v27 }
 0xbc2   :  { %466 = vrot.lane.b32.xlu0 %v464_v32, %s847_s25 }
 0xbc3   :  { %468 = vrot.lane.b32.xlu1 %v465_v33, %s847_s25 }
 0xbc6   :  { %470 = vrot.lane.b32.xlu0 %v464_v32, %s848_s26 }
 0xbc7   :  { %472 = vrot.lane.b32.xlu1 %v465_v33, %s848_s26 }
 0xc34   :  { %v467_v34 = vpop.permute.xlu0 %466 }
 0xc35   :  { %v469_v35 = vpop.permute.xlu1 %468 }
 0xc38   :  { %v471_v28 = vpop.permute.xlu0 %470 }
 0xc39   :  { %v473_v36 = vpop.permute.xlu1 %472  ;;  %v474_v38 = vsel %vm908_vm1, %v471_v28, %v467_v34 }
 0xc3a   :  { %v475_v39 = vsel %vm908_vm1, %v473_v36, %v469_v35  ;;  %v476_v40 = vadd.f32 %v474_v38, %v464_v32 }
 0xc3b   :  { %v477_v41 = vadd.f32 %v475_v39, %v465_v33 }
 0xc3c   :  { %478 = vrot.lane.b32.xlu0 %v476_v40, %s849_s27 }
 0xc3d   :  { %480 = vrot.lane.b32.xlu1 %v477_v41, %s849_s27 }
 0xc40   :  { %482 = vrot.lane.b32.xlu0 %v476_v40, %s850_s28 }
 0xc41   :  { %484 = vrot.lane.b32.xlu1 %v477_v41, %s850_s28 }
 0xcae   :  { %v479_v42 = vpop.permute.xlu0 %478 }
 0xcaf   :  { %v481_v43 = vpop.permute.xlu1 %480 }
 0xcb2   :  { %v483_v44 = vpop.permute.xlu0 %482 }
 0xcb3   :  { %v485_v45 = vpop.permute.xlu1 %484  ;;  %v486_v46 = vsel %vm920_vm2, %v483_v44, %v479_v42 }
 0xcb4   :  { %v487_v47 = vsel %vm920_vm2, %v485_v45, %v481_v43  ;;  %v488_v49 = vadd.f32 %v486_v46, %v476_v40 }
 0xcb5   :  { %v489_v50 = vadd.f32 %v487_v47, %v477_v41 }
 0xcb6   :  { %490 = vrot.lane.b32.xlu0 %v488_v49, %s851_s29 }
 0xcb7   :  { %492 = vrot.lane.b32.xlu1 %v489_v50, %s851_s29 }
 0xcba   :  { %494 = vrot.lane.b32.xlu0 %v488_v49, %s844_s20 }
 0xcbb   :  { %496 = vrot.lane.b32.xlu1 %v489_v50, %s844_s20 }
 0xd28   :  { %v491_v51 = vpop.permute.xlu0 %490 }
 0xd29   :  { %v493_v52 = vpop.permute.xlu1 %492 }
 0xd2c   :  { %v495_v53 = vpop.permute.xlu0 %494 }
 0xd2d   :  { %v497_v54 = vpop.permute.xlu1 %496  ;;  %v498_v55 = vsel %vm932_vm3, %v495_v53, %v491_v51 }
 0xd2e   :  { %v499_v56 = vsel %vm932_vm3, %v497_v54, %v493_v52  ;;  %v500_v57 = vadd.f32 %v498_v55, %v488_v49 }
 0xd2f   :  { %v501_v59 = vadd.f32 %v499_v56, %v489_v50 }
 0xd30   :  { %762 = vlog2.f32 %v500_v57 }
 0xd31   :  { %764 = vlog2.f32 %v501_v59 }
 0xd3a   :  { %v763_v60 = vpop.eup %762 }
 0xd3b   :  { %v765_v61 = vpop.eup %764  ;;  %v503_v62 = vmul.f32 0.6931472, %v763_v60 }
 0xd3c   :  { %v505_v63 = vmul.f32 0.6931472, %v765_v61 }
 0xd3d   :  { %v506_v0 = vsub.f32 %v448_v19, %v503_v62 }
 0xd3e   :  { %v507_v1 = vsub.f32 %v449_v20, %v505_v63 }
 0xd3f   :  { %v508_v2 = vmul.f32 1.442695, %v506_v0 }
 0xd40   :  { %v510_v3 = vmul.f32 1.442695, %v507_v1 }
 0xd41   :  { %766 = vpow2.f32 %v508_v2 }
 0xd42   :  { %768 = vpow2.f32 %v510_v3 }
 0xd4b   :  { %v767_v5 = vpop.eup %766 }
 0xd4c   :  { %v769_v6 = vpop.eup %768 }
 0xd4d   :  { %v512_v7 = vadd.f32 %v769_v6, %v767_v5 }
 0xd4f   :  { %v513_v8 = vrot.slane %v512_v7, 4 }
 0xd51   :  { %v514_v9 = vadd.f32 %v513_v8, %v512_v7 }
 0xd53   :  { %v515_v10 = vrot.slane %v514_v9, 2 }
 0xd55   :  { %v516_v11 = vadd.f32 %v515_v10, %v514_v9 }
 0xd57   :  { %v517_v12 = vrot.slane %v516_v11, 1 }
 0xd59   :  { %v518_v13 = vadd.f32 %v517_v12, %v516_v11 }
 0xd5b   :  { %770 = vlog2.f32 %v518_v13 }
 0xd65   :  { %v771_v14 = vpop.eup %770 }
 0xd66   :  { %v520_v15 = vmul.f32 0.6931472, %v771_v14 }
 0xd68   :  { %v521_v16 = vsub.f32 %v506_v0, %v520_v15  ;;  %v522_v17 = vsub.f32 %v507_v1, %v520_v15 }
 0xd6a   :  { %v523_v18 = vmul.f32 1.442695, %v521_v16  ;;  %v525_v19 = vmul.f32 1.442695, %v522_v17 }
 0xd6c   :  { %772 = vpow2.f32 %v523_v18 }
 0xd6d   :  { %774 = vpow2.f32 %v525_v19 }
 0xd76   :  { %v773_v20 = vpop.eup %772 }
 0xd77   :  { %v775_v21 = vpop.eup %774  ;;  %527 = vrot.lane.b32.xlu0 %v773_v20, %s846_s1 }
 0xd78   :  { %529 = vrot.lane.b32.xlu1 %v775_v21, %s846_s1 }
 0xd7b   :  { %531 = vrot.lane.b32.xlu0 %v773_v20, %s845_s0 }
 0xd7c   :  { %533 = vrot.lane.b32.xlu1 %v775_v21, %s845_s0 }
 0xde9   :  { %v528_v22 = vpop.permute.xlu0 %527 }
 0xdea   :  { %v530_v23 = vpop.permute.xlu1 %529 }
 0xded   :  { %v532_v24 = vpop.permute.xlu0 %531 }
 0xdee   :  { %v534_v25 = vpop.permute.xlu1 %533  ;;  %v535_v26 = vsel %vm896_vm0, %v532_v24, %v528_v22 }
 0xdef   :  { %v536_v29 = vsel %vm896_vm0, %v534_v25, %v530_v23  ;;  %v537_v30 = vadd.f32 %v773_v20, %v535_v26 }
 0xdf0   :  { %v538_v31 = vadd.f32 %v775_v21, %v536_v29 }
 0xdf1   :  { %539 = vrot.lane.b32.xlu0 %v537_v30, %s847_s25 }
 0xdf2   :  { %541 = vrot.lane.b32.xlu1 %v538_v31, %s847_s25 }
 0xdf5   :  { %543 = vrot.lane.b32.xlu0 %v537_v30, %s848_s26 }
 0xdf6   :  { %545 = vrot.lane.b32.xlu1 %v538_v31, %s848_s26 }
 0xe63   :  { %v540_v27 = vpop.permute.xlu0 %539 }
 0xe64   :  { %v542_v32 = vpop.permute.xlu1 %541 }
 0xe67   :  { %v544_v33 = vpop.permute.xlu0 %543 }
 0xe68   :  { %v546_v34 = vpop.permute.xlu1 %545  ;;  %v547_v35 = vsel %vm908_vm1, %v544_v33, %v540_v27 }
 0xe69   :  { %v548_v28 = vsel %vm908_vm1, %v546_v34, %v542_v32  ;;  %v549_v36 = vadd.f32 %v547_v35, %v537_v30 }
 0xe6a   :  { %v550_v38 = vadd.f32 %v548_v28, %v538_v31 }
 0xe6b   :  { %551 = vrot.lane.b32.xlu0 %v549_v36, %s849_s27 }
 0xe6c   :  { %553 = vrot.lane.b32.xlu1 %v550_v38, %s849_s27 }
 0xe6f   :  { %555 = vrot.lane.b32.xlu0 %v549_v36, %s850_s28 }
 0xe70   :  { %557 = vrot.lane.b32.xlu1 %v550_v38, %s850_s28 }
 0xedd   :  { %v552_v39 = vpop.permute.xlu0 %551 }
 0xede   :  { %v554_v40 = vpop.permute.xlu1 %553 }
 0xee1   :  { %v556_v41 = vpop.permute.xlu0 %555 }
 0xee2   :  { %v558_v42 = vpop.permute.xlu1 %557  ;;  %v559_v43 = vsel %vm920_vm2, %v556_v41, %v552_v39 }
 0xee3   :  { %v560_v44 = vsel %vm920_vm2, %v558_v42, %v554_v40  ;;  %v561_v45 = vadd.f32 %v559_v43, %v549_v36 }
 0xee4   :  { %v562_v46 = vadd.f32 %v560_v44, %v550_v38 }
 0xee5   :  { %563 = vrot.lane.b32.xlu0 %v561_v45, %s851_s29 }
 0xee6   :  { %565 = vrot.lane.b32.xlu1 %v562_v46, %s851_s29 }
 0xee9   :  { %567 = vrot.lane.b32.xlu0 %v561_v45, %s844_s20 }
 0xeea   :  { %569 = vrot.lane.b32.xlu1 %v562_v46, %s844_s20 }
 0xf57   :  { %v564_v47 = vpop.permute.xlu0 %563 }
 0xf58   :  { %v566_v49 = vpop.permute.xlu1 %565 }
 0xf5b   :  { %v568_v50 = vpop.permute.xlu0 %567 }
 0xf5c   :  { %v570_v51 = vpop.permute.xlu1 %569  ;;  %v571_v52 = vsel %vm932_vm3, %v568_v50, %v564_v47 }
 0xf5d   :  { %v572_v53 = vsel %vm932_vm3, %v570_v51, %v566_v49  ;;  %v573_v54 = vadd.f32 %v571_v52, %v561_v45 }
 0xf5e   :  { %v574_v55 = vadd.f32 %v572_v53, %v562_v46 }
 0xf5f   :  { %776 = vlog2.f32 %v573_v54 }
 0xf60   :  { %778 = vlog2.f32 %v574_v55 }
 0xf69   :  { %v777_v56 = vpop.eup %776 }
 0xf6a   :  { %v779_v57 = vpop.eup %778  ;;  %v576_v59 = vmul.f32 0.6931472, %v777_v56 }
 0xf6b   :  { %v578_v60 = vmul.f32 0.6931472, %v779_v57 }
 0xf6c   :  { %v579_v61 = vsub.f32 %v521_v16, %v576_v59 }
 0xf6d   :  { %v580_v62 = vsub.f32 %v522_v17, %v578_v60 }
 0xf6e   :  { %v581_v63 = vmul.f32 1.442695, %v579_v61 }
 0xf6f   :  { %v583_v0 = vmul.f32 1.442695, %v580_v62 }
 0xf70   :  { %780 = vpow2.f32 %v581_v63 }
 0xf71   :  { %782 = vpow2.f32 %v583_v0 }
 0xf7a   :  { %v781_v1 = vpop.eup %780 }
 0xf7b   :  { %v783_v2 = vpop.eup %782 }
 0xf7c   :  { %v585_v3 = vadd.f32 %v783_v2, %v781_v1 }
 0xf7e   :  { %v586_v5 = vrot.slane %v585_v3, 4 }
 0xf80   :  { %v587_v6 = vadd.f32 %v586_v5, %v585_v3 }
 0xf82   :  { %v588_v7 = vrot.slane %v587_v6, 2 }
 0xf84   :  { %v589_v8 = vadd.f32 %v588_v7, %v587_v6 }
 0xf86   :  { %v590_v9 = vrot.slane %v589_v8, 1 }
 0xf88   :  { %v591_v10 = vadd.f32 %v590_v9, %v589_v8 }
 0xf8a   :  { %784 = vlog2.f32 %v591_v10 }
 0xf94   :  { %v785_v11 = vpop.eup %784 }
 0xf95   :  { %v593_v12 = vmul.f32 0.6931472, %v785_v11 }
 0xf97   :  { %v594_v13 = vsub.f32 %v579_v61, %v593_v12  ;;  %v595_v14 = vsub.f32 %v580_v62, %v593_v12 }
 0xf99   :  { %v596_v15 = vmul.f32 1.442695, %v594_v13  ;;  %v598_v16 = vmul.f32 1.442695, %v595_v14 }
 0xf9b   :  { %786 = vpow2.f32 %v596_v15 }
 0xf9c   :  { %788 = vpow2.f32 %v598_v16 }
 0xfa5   :  { %v787_v17 = vpop.eup %786 }
 0xfa6   :  { %v789_v18 = vpop.eup %788  ;;  %600 = vrot.lane.b32.xlu0 %v787_v17, %s846_s1 }
 0xfa7   :  { %602 = vrot.lane.b32.xlu1 %v789_v18, %s846_s1 }
 0xfaa   :  { %604 = vrot.lane.b32.xlu0 %v787_v17, %s845_s0 }
 0xfab   :  { %606 = vrot.lane.b32.xlu1 %v789_v18, %s845_s0 }
0x1018   :  { %v601_v19 = vpop.permute.xlu0 %600 }
0x1019   :  { %v603_v20 = vpop.permute.xlu1 %602 }
0x101c   :  { %v605_v21 = vpop.permute.xlu0 %604 }
0x101d   :  { %v607_v22 = vpop.permute.xlu1 %606  ;;  %v608_v23 = vsel %vm896_vm0, %v605_v21, %v601_v19 }
0x101e   :  { %v609_v24 = vsel %vm896_vm0, %v607_v22, %v603_v20  ;;  %v610_v25 = vadd.f32 %v787_v17, %v608_v23 }
0x101f   :  { %v611_v26 = vadd.f32 %v789_v18, %v609_v24 }
0x1020   :  { %612 = vrot.lane.b32.xlu0 %v610_v25, %s847_s25 }
0x1021   :  { %614 = vrot.lane.b32.xlu1 %v611_v26, %s847_s25 }
0x1024   :  { %616 = vrot.lane.b32.xlu0 %v610_v25, %s848_s26 }
0x1025   :  { %618 = vrot.lane.b32.xlu1 %v611_v26, %s848_s26 }
0x1092   :  { %v613_v29 = vpop.permute.xlu0 %612 }
0x1093   :  { %v615_v30 = vpop.permute.xlu1 %614 }
0x1096   :  { %v617_v31 = vpop.permute.xlu0 %616 }
0x1097   :  { %v619_v27 = vpop.permute.xlu1 %618  ;;  %v620_v32 = vsel %vm908_vm1, %v617_v31, %v613_v29 }
0x1098   :  { %v621_v37 = vsel %vm908_vm1, %v619_v27, %v615_v30  ;;  %v622_v33 = vadd.f32 %v620_v32, %v610_v25 }
0x1099   :  { %v623_v34 = vadd.f32 %v621_v37, %v611_v26 }
0x109a   :  { %624 = vrot.lane.b32.xlu0 %v622_v33, %s849_s27 }
0x109b   :  { %626 = vrot.lane.b32.xlu1 %v623_v34, %s849_s27 }
0x109e   :  { %628 = vrot.lane.b32.xlu0 %v622_v33, %s850_s28 }
0x109f   :  { %630 = vrot.lane.b32.xlu1 %v623_v34, %s850_s28 }
0x110c   :  { %v625_v35 = vpop.permute.xlu0 %624 }
0x110d   :  { %v627_v28 = vpop.permute.xlu1 %626 }
0x1110   :  { %v629_v36 = vpop.permute.xlu0 %628 }
0x1111   :  { %v631_v38 = vpop.permute.xlu1 %630  ;;  %v632_v39 = vsel %vm920_vm2, %v629_v36, %v625_v35 }
0x1112   :  { %v633_v48 = vsel %vm920_vm2, %v631_v38, %v627_v28  ;;  %v634_v40 = vadd.f32 %v632_v39, %v622_v33 }
0x1113   :  { %v635_v41 = vadd.f32 %v633_v48, %v623_v34 }
0x1114   :  { %636 = vrot.lane.b32.xlu0 %v634_v40, %s851_s29 }
0x1115   :  { %638 = vrot.lane.b32.xlu1 %v635_v41, %s851_s29 }
0x1118   :  { %640 = vrot.lane.b32.xlu0 %v634_v40, %s844_s20 }
0x1119   :  { %642 = vrot.lane.b32.xlu1 %v635_v41, %s844_s20 }
0x1186   :  { %v637_v42 = vpop.permute.xlu0 %636 }
0x1187   :  { %v639_v43 = vpop.permute.xlu1 %638 }
0x118a   :  { %v641_v44 = vpop.permute.xlu0 %640 }
0x118b   :  { %v643_v45 = vpop.permute.xlu1 %642  ;;  %v644_v46 = vsel %vm932_vm3, %v641_v44, %v637_v42 }
0x118c   :  { %v645_v58 = vsel %vm932_vm3, %v643_v45, %v639_v43  ;;  %v646_v47 = vadd.f32 %v644_v46, %v634_v40 }
0x118d   :  { %v647_v49 = vadd.f32 %v645_v58, %v635_v41 }
0x118e   :  { %790 = vrcp.f32 %v646_v47 }
0x118f   :  { %792 = vrcp.f32 %v647_v49 }
0x1198   :  { %v791_v50 = vpop.eup %790 }
0x1199   :  { %v793_v51 = vpop.eup %792  ;;  %v649_v52 = vmul.f32 %v791_v50, %v787_v17 }
0x119a   :  { %v651_v53 = vmul.f32 %v793_v51, %v789_v18 }
0x119b   :  { %652 = vst [vmem:[#allocation7] sm:$0xff] %v649_v52 }
0x119c   :  { %653 = vst [vmem:[#allocation7 + $0x8] sm:$0xff] %v651_v53 }
0x119d   :  { %827 = shalt.err (!%p824_p12)
}
0x119e   :  { %s828_s7 = scalar_lea.hbm %s1183_s2, 256 }
0x119f   :  { %p829_p13 = scmp.ne.s32.totalorder %s1183_s2, %s828_s7  ;;  %p832_p0 = scmp.lt.u32.totalorder %s828_s7, %s1183_s2 }
0x11a1   :  { %p834_p1 = pnand %p832_p0, %p829_p13 }
0x11a3   :  { %837 = shalt.err (!%p834_p1)
}
0x11a4   :  { %665 = dma.vmem_to_hbm [thread:$0]  %s660_s3, 256, %s1183_s2, [#allocation6], %s843_s19, %s843_s19, %s844_s20  }
0x11a5   :  { %840 = dma.done.wait [#allocation6], 256  }
0x11a6   :  { %841 = vsyncadd [#allocation6], 4294967040 }
0x11a7   :  { %669 = vsyncpa [#allocation5], 1 }
0x11a8   :  { %670 = vsyncpa [#allocation6], 1 }

</bundles_post_ra>
